<compile_context>
chip_gen: v5e
topology: v5e:2x2
jax: 0.10.0
libtpu: 0.0.40
codegen_flags: <defaults>
</compile_context>

<pallas_src>
import math
from functools import partial

import numpy as np
import jax
import jax.numpy as jnp
from jax.experimental import pallas as pl
from jax.experimental.pallas import tpu as pltpu

EPS = 1e-5
PAD = 128          # lane-dense channel padding for every activation / weight


# ------------------------------ fused Pallas kernel --------------------------

def _fused_kernel(x_ref, wr_ref, br_ref, wm_ref, bm_ref, pool_ref, fcw_ref,
                  fcb_ref, pe_ref, scale_ref, shift_ref, o_ref, *, B, L):
    # x_ref : [M, sta_in+c_in]      raw input (whole-array block)
    # wr_ref: [9, 3*PAD, PAD] bf16  rest-block + cnn1 conv weights (taps stacked)
    # br_ref: [9, 1, PAD] f32       their biases
    # wm_ref: [6*PAD, PAD] bf16     merged token-conv + final-static-conv weights
    # bm_ref: [1, PAD] f32          summed bias of the merged convs
    # pool_ref: [32, L] f32   fcw_ref: [L, 32] f32   fcb_ref: [L, PAD] f32
    # pe_ref: [M, PAD] f32    scale/shift: [1, PAD] f32 (final eval BatchNorm)
    f32, bf16 = jnp.float32, jnp.bfloat16
    M, C = o_ref.shape
    CIN = x_ref.shape[1]

    # Lane-pad the raw [M, sta_in+c_in] input to [M, 128] with one tiny MXU matmul
    # against an in-kernel identity (replaces the host-side pad dispatches).
    row = jax.lax.broadcasted_iota(jnp.int32, (CIN, C), 0)
    col = jax.lax.broadcasted_iota(jnp.int32, (CIN, C), 1)
    eye = (row == col).astype(f32)
    x128 = jnp.dot(x_ref[...], eye, preferred_element_type=f32)          # [M, C]

    # Row masks zeroing the t-1 / t+1 taps at sequence edges so rolling over the
    # flattened [B*L] sublane axis never mixes batches or wraps around.
    t_in_seq = jax.lax.broadcasted_iota(jnp.int32, (M, C), 0) % L
    first_mask = (t_in_seq != 0).astype(f32)
    last_mask = (t_in_seq != L - 1).astype(f32)

    def cat3(x):
        # k=3 "same" conv LHS: [x(t-1) | x(t) | x(t+1)]; cast to bf16 only at the MXU.
        xp = pltpu.roll(x, 1, 0) * first_mask        # row t holds x[t-1]
        xn = pltpu.roll(x, M - 1, 0) * last_mask     # row t holds x[t+1]
        return jnp.concatenate([xp, x, xn], axis=1).astype(bf16)         # [M, 3C]

    def conv3(x, idx, relu):
        out = jnp.dot(cat3(x), wr_ref[idx], preferred_element_type=f32) + br_ref[idx]
        return jnp.maximum(out, 0.0) if relu else out

    # Token-conv LHS built once; its matmul is merged with the final static conv.
    xcat_tok = cat3(x128)

    # StaticEmbedding: 4 residual rest blocks.  h starts as the full padded input:
    # the value-channel lanes [sta_in:CIN] ride along through the residual adds but
    # only ever meet zero weight rows, so they never influence a real output lane.
    h = x128
    for r in range(4):
        mid = conv3(h, 2 * r, relu=True)
        h = h + conv3(mid, 2 * r + 1, relu=False)

    # SPP (AdaptiveAvgPool 1/4/9/16) + Linear(30 -> num_node) + ReLU + residual,
    # done with two skinny per-batch matmuls (no O((B*L)^2) folded matrix).
    # fcb is broadcast across ALL lanes; the spurious relu(fc_b) it adds to lanes
    # >= sta_in of h is harmless (zero weight rows downstream, see pack_conv).
    feats = []
    for b in range(B):
        h_b = h[b * L:(b + 1) * L, :]                                     # [L, C]
        pooled = jnp.dot(pool_ref[...], h_b, preferred_element_type=f32)  # [32, C]
        fb = jnp.dot(fcw_ref[...], pooled, preferred_element_type=f32) + fcb_ref[...]
        feats.append(jnp.maximum(fb, 0.0))
    h = h + jnp.concatenate(feats, axis=0)

    # StaticEmbedding cnn: conv(sta_in->64)+BN+ReLU ...
    h = conv3(h, 8, relu=True)
    # ... then its final conv(64->d_model) fused with the TokenEmbedding conv into a
    # single matmul: [xcat_tok | cat3(h)] @ [W_tok ; W_cnn2] + (b_tok + b_cnn2).
    lhs = jnp.concatenate([xcat_tok, cat3(h)], axis=1)                    # [M, 6C]
    y = jnp.dot(lhs, wm_ref[...], preferred_element_type=f32) + bm_ref[...]

    # + positional embedding, then eval-mode BatchNorm as a per-channel affine.
    y = y + pe_ref[...]
    o_ref[...] = (y * scale_ref[...] + shift_ref[...]).astype(o_ref.dtype)


def _fused_call(x_flat, p, *, B, L):
    M = x_flat.shape[0]
    C = PAD
    operands = (x_flat, p["W_rest"], p["B_rest"], p["W_merge"], p["b_merge"],
                p["pool"], p["fcw"], p["fcb"], p["pe"], p["scale"], p["shift"])
    s_pad = p["pool"].shape[0]
    flops = int(2 * M * x_flat.shape[1] * C            # in-kernel lane pad
                + 9 * 2 * M * (3 * C) * C              # rest blocks + cnn1 convs
                + 2 * M * (6 * C) * C                  # merged token + cnn2 conv
                + B * (2 * s_pad * L * C + 2 * L * s_pad * C))   # per-batch SPP+fc
    bytes_accessed = int(sum(int(a.size) * a.dtype.itemsize for a in operands)
                         + M * C * 4)
    return pl.pallas_call(
        partial(_fused_kernel, B=B, L=L),
        out_shape=jax.ShapeDtypeStruct((M, C), jnp.float32),
        # No grid: single invocation, every operand a whole-array VMEM block
        # (no auto-pipelining, so nothing gets needlessly double-buffered).
        in_specs=[pl.BlockSpec(memory_space=pltpu.MemorySpace.VMEM)
                  for _ in operands],
        out_specs=pl.BlockSpec(memory_space=pltpu.MemorySpace.VMEM),
        cost_estimate=pl.CostEstimate(flops=flops, transcendentals=0,
                                      bytes_accessed=bytes_accessed),
    )(*operands)


# ------------------------------ parameter setup (glue) ------------------------

def adaptive_pool_matrix(L, sizes):
    """[L, sum(sizes)] matrix reproducing torch AdaptiveAvgPool1d windows."""
    cols = []
    for S in sizes:
        P = np.zeros((L, S), np.float32)
        for i in range(S):
            start = (i * L) // S
            end = -(-((i + 1) * L) // S)     # ceil
            P[start:end, i] = 1.0 / (end - start)
        cols.append(P)
    return np.concatenate(cols, axis=1)


def positional_embedding(L, d_model):
    position = np.arange(L, dtype=np.float32)[:, None]
    div_term = np.exp(np.arange(0, d_model, 2, dtype=np.float32)
                      * -(math.log(10000.0) / d_model))
    pe = np.zeros((L, d_model), np.float32)
    pe[:, 0::2] = np.sin(position * div_term)
    pe[:, 1::2] = np.cos(position * div_term)
    return jnp.asarray(pe)[None]             # [1, L, D]


def init_conv_params(key, cin, cout, k=3, scale=0.1):
    kw, kb = jax.random.split(key)
    w = scale * jax.random.normal(kw, (cout, cin, k), jnp.float32)
    b = scale * jax.random.normal(kb, (cout,), jnp.float32)
    return w, b


def init_bn_params(c):
    i = jnp.arange(c, dtype=jnp.float32)
    return (1.0 + 0.1 * jnp.cos(i), 0.05 * jnp.sin(i), 0.01 * i, 1.0 + 0.02 * i)


def fold_bn(w, b, bn):
    gamma, beta, mean, var = bn
    a = gamma / jnp.sqrt(var + EPS)
    return w * a[:, None, None], a * (b - mean) + beta


def to_kernel_layout(w):   # torch [Cout, Cin, K] -> [K, Cin, Cout]
    return jnp.transpose(w, (2, 1, 0))


def build_params(key, c_in, sta_in, d_model, num_node, L, B):
    assert num_node == L, "num_node must equal sequence length (torch residual add)"
    assert max(sta_in + c_in, d_model, 64) <= PAD
    keys = jax.random.split(key, 12)
    raw = {"sta_in": sta_in, "d_model": d_model}

    # TokenEmbedding: Conv1d(c_in -> d_model, k=3, pad=1) + BatchNorm1d (folded).
    w, b = init_conv_params(keys[0], c_in, d_model)
    w, b = fold_bn(w, b, init_bn_params(d_model))
    raw["tok_w"], raw["tok_b"] = to_kernel_layout(w), b

    # StaticEmbedding: 4 residual rest blocks (conv+BN+ReLU, conv).
    rest = []
    for r in range(4):
        w1, b1 = init_conv_params(keys[1 + 2 * r], sta_in, 64)
        w1, b1 = fold_bn(w1, b1, init_bn_params(64))
        w2, b2 = init_conv_params(keys[2 + 2 * r], 64, sta_in)
        rest.append(dict(w1=to_kernel_layout(w1), b1=b1,
                         w2=to_kernel_layout(w2), b2=b2))
    raw["rest"] = rest

    # SPP pooling (1,4,9,16 -> 30) + fc Linear(30 -> num_node).
    raw["pool_T"] = jnp.asarray(adaptive_pool_matrix(L, (1, 4, 9, 16)).T)   # [30, L]
    kf1, kf2 = jax.random.split(keys[9])
    raw["fc_w"] = 0.1 * jax.random.normal(kf1, (num_node, 30), jnp.float32)
    raw["fc_b"] = 0.1 * jax.random.normal(kf2, (num_node,), jnp.float32)

    # StaticEmbedding cnn: conv(sta_in->64)+BN+ReLU, conv(64->d_model).
    w1, b1 = init_conv_params(keys[10], sta_in, 64)
    w1, b1 = fold_bn(w1, b1, init_bn_params(64))
    w2, b2 = init_conv_params(keys[11], 64, d_model)
    raw["cnn_w1"], raw["cnn_b1"] = to_kernel_layout(w1), b1
    raw["cnn_w2"], raw["cnn_b2"] = to_kernel_layout(w2), b2

    raw["pe"] = positional_embedding(L, d_model)                 # [1, L, D]

    gamma, beta, mean, var = init_bn_params(d_model)
    scale = gamma / jnp.sqrt(var + EPS)
    raw["final_scale"] = scale
    raw["final_shift"] = beta - scale * mean

    # ---------------- pack for the fused kernel ----------------
    # INVARIANT: every packed conv weight is zero outside its true
    # [cin_offset : cin_offset+Cin] input rows and [:Cout] output columns, so junk
    # in h's padded lanes (value channels riding along, relu(fc_b) from the SPP
    # bias broadcast) can never reach a real output lane.
    def pack_conv(w_knc, bias, cin_offset=0):
        K, Cin, Cout = w_knc.shape
        wp = jnp.zeros((K, PAD, PAD), jnp.float32)
        wp = wp.at[:, cin_offset:cin_offset + Cin, :Cout].set(w_knc)
        bp = jnp.zeros((1, PAD), jnp.float32).at[0, :Cout].set(bias)
        return wp.reshape(K * PAD, PAD), bp

    conv_list = []
    for blk in rest:
        conv_list += [(blk["w1"], blk["b1"]), (blk["w2"], blk["b2"])]
    conv_list.append((raw["cnn_w1"], raw["cnn_b1"]))
    ws, bs = zip(*[pack_conv(w, b) for w, b in conv_list])

    # Token conv reads the value channels at lanes [sta_in : sta_in+c_in] of the
    # in-kernel lane-padded input; merged with the final static conv (lanes [:64]).
    w_tok, b_tok = pack_conv(raw["tok_w"], raw["tok_b"], cin_offset=sta_in)
    w_cnn2, b_cnn2 = pack_conv(raw["cnn_w2"], raw["cnn_b2"])

    M = B * L
    S, S_PAD = 30, 32
    packed = {
        "W_rest": jnp.stack(ws).astype(jnp.bfloat16),                   # [9,384,128]
        "B_rest": jnp.stack(bs),                                        # [9,1,128]
        "W_merge": jnp.concatenate([w_tok, w_cnn2], 0).astype(jnp.bfloat16),  # [768,128]
        "b_merge": b_tok + b_cnn2,                                      # [1,128]
        "pool": jnp.zeros((S_PAD, L), jnp.float32).at[:S, :].set(raw["pool_T"]),
        "fcw": jnp.zeros((num_node, S_PAD), jnp.float32).at[:, :S].set(raw["fc_w"]),
        "fcb": jnp.broadcast_to(raw["fc_b"][:, None], (num_node, PAD)),
        "pe": jnp.zeros((M, PAD), jnp.float32).at[:, :d_model].set(
            jnp.tile(raw["pe"][0], (B, 1))),
        "scale": jnp.zeros((1, PAD), jnp.float32).at[0, :d_model].set(scale),
        "shift": jnp.zeros((1, PAD), jnp.float32).at[0, :d_model].set(
            raw["final_shift"]),
    }
    return raw, packed


# ------------------------------ forward ---------------------------------------

def data_embedding_forward(packed, x, x_mark=None):
    """x: [B, L, sta_in + c_in] channel-last; x_mark unused (matches torch code).

    Returns the lane-dense [B, L, 128] embedding; the consumer slices
    [:, :, :d_model] (kept padded here so the kernel store is a full-width vst).
    Rows of the flattened [B*L] axis are whole length-L sequences (required by the
    roll+mask conv-tap scheme).
    """
    del x_mark
    B, L, _ = x.shape
    x_flat = x.reshape(B * L, x.shape[-1])
    out = _fused_call(x_flat, packed, B=B, L=L)
    return out.reshape(B, L, PAD)


# ------------------- pure-JAX reference (structural sanity check) -------------

def reference_forward(raw, x):
    hi = jax.lax.Precision.HIGHEST
    sta_in = raw["sta_in"]
    xv, xs = x[:, :, sta_in:], x[:, :, :sta_in]

    def conv3(h, w_knc, b, relu=False):
        hp = jnp.pad(h, ((0, 0), (1, 1), (0, 0)))
        out = (jnp.einsum('blc,cd->bld', hp[:, :-2], w_knc[0], precision=hi)
               + jnp.einsum('blc,cd->bld', hp[:, 1:-1], w_knc[1], precision=hi)
               + jnp.einsum('blc,cd->bld', hp[:, 2:], w_knc[2], precision=hi) + b)
        return jnp.maximum(out, 0.0) if relu else out

    tok = conv3(xv, raw["tok_w"], raw["tok_b"])
    h = xs
    for blk in raw["rest"]:
        mid = conv3(h, blk["w1"], blk["b1"], relu=True)
        h = h + conv3(mid, blk["w2"], blk["b2"])
    pooled = jnp.einsum('sl,blc->bsc', raw["pool_T"], h, precision=hi)
    feat = jnp.maximum(jnp.einsum('ns,bsc->bnc', raw["fc_w"], pooled, precision=hi)
                       + raw["fc_b"][None, :, None], 0.0)
    h = h + feat
    h = conv3(h, raw["cnn_w1"], raw["cnn_b1"], relu=True)
    sta = conv3(h, raw["cnn_w2"], raw["cnn_b2"])
    y = tok + raw["pe"] + sta
    return y * raw["final_scale"] + raw["final_shift"]


# ------------------------------ main ------------------------------------------

if __name__ == "__main__":
    B, L = 2, 16
    c_in, sta_in = 4, 3
    d_model = 32
    num_node = L    # must equal L so x + spp_feature broadcasts (as in torch code)

    key = jax.random.PRNGKey(0)
    kx, kp = jax.random.split(key)
    x = jax.random.normal(kx, (B, L, sta_in + c_in), jnp.float32)
    x_mark = jnp.zeros((B, L, 4), jnp.float32)   # unused, kept for parity

    raw, packed = build_params(kp, c_in, sta_in, d_model, num_node, L, B)

    out_pad = data_embedding_forward(packed, x, x_mark)      # [B, L, 128] lane-dense
    out_pad = jax.block_until_ready(out_pad)

    # Consumer-side slice to the real model width (validation only).
    out = out_pad[:, :, :d_model]
    assert out.shape == (B, L, d_model), out.shape
    assert bool(jnp.all(jnp.isfinite(out)))

    ref = reference_forward(raw, x)
    max_err = float(jnp.max(jnp.abs(out - ref)))
    # Tolerance covers bf16 MXU operands (f32 accumulation) vs HIGHEST-precision ref.
    assert max_err < 1e-1, f"mismatch vs pure-JAX reference: {max_err}"
    print("KERNEL_OK")
</pallas_src>

<mosaic_0001>
module attributes {stable_mosaic.version = 11 : i64} {
  func.func @_fused_kernel(%arg0: memref<32x7xf32, #tpu.memory_space<vmem>>, %arg1: memref<9x384x128xbf16, #tpu.memory_space<vmem>>, %arg2: memref<9x1x128xf32, #tpu.memory_space<vmem>>, %arg3: memref<768x128xbf16, #tpu.memory_space<vmem>>, %arg4: memref<1x128xf32, #tpu.memory_space<vmem>>, %arg5: memref<32x16xf32, #tpu.memory_space<vmem>>, %arg6: memref<16x32xf32, #tpu.memory_space<vmem>>, %arg7: memref<16x128xf32, #tpu.memory_space<vmem>>, %arg8: memref<32x128xf32, #tpu.memory_space<vmem>>, %arg9: memref<1x128xf32, #tpu.memory_space<vmem>>, %arg10: memref<1x128xf32, #tpu.memory_space<vmem>>, %arg11: memref<32x128xf32, #tpu.memory_space<vmem>>) attributes {dimension_semantics = [], scalar_prefetch = 0 : i64, scratch_operands = 0 : i64, tpu.core_type = #tpu.core_type<tc>} {
    %0 = tpu.iota {dimensions = array<i32: 0>} : vector<7x128xi32>
    %1 = tpu.iota {dimensions = array<i32: 1>} : vector<7x128xi32>
    %2 = arith.cmpi eq, %0, %1 : vector<7x128xi32>
    %3 = arith.extui %2 : vector<7x128xi1> to vector<7x128xi32>
    %4 = arith.sitofp %3 : vector<7x128xi32> to vector<7x128xf32>
    %c0 = arith.constant 0 : index
    %c0_0 = arith.constant 0 : index
    %5 = vector.load %arg0[%c0, %c0_0] : memref<32x7xf32, #tpu.memory_space<vmem>>, vector<32x7xf32>
    %cst = arith.constant dense<0.000000e+00> : vector<32x128xf32>
    %6 = tpu.matmul %5, %4, %cst {dimension_numbers = #tpu.dot_dimension_numbers<[1], [0], [0], [1], [0, 0, 1, 1], [], []>} : vector<32x7xf32>, vector<7x128xf32>, vector<32x128xf32> -> vector<32x128xf32>
    %7 = tpu.iota {dimensions = array<i32: 0>} : vector<32x128xi32>
    %c16_i32 = arith.constant 16 : i32
    %c0_i32 = arith.constant 0 : i32
    %8 = arith.cmpi eq, %c16_i32, %c0_i32 : i32
    %c1_i32 = arith.constant 1 : i32
    %9 = arith.select %8, %c1_i32, %c16_i32 : i32
    %10 = vector.broadcast %9 : i32 to vector<32x128xi32>
    %11 = arith.remsi %7, %10 : vector<32x128xi32>
    %c0_i32_1 = arith.constant 0 : i32
    %12 = vector.broadcast %c0_i32_1 : i32 to vector<32x128xi32>
    %13 = arith.cmpi ne, %11, %12 : vector<32x128xi32>
    %c0_i32_2 = arith.constant 0 : i32
    %14 = vector.broadcast %c0_i32_2 : i32 to vector<32x128xi32>
    %15 = arith.cmpi slt, %11, %14 : vector<32x128xi32>
    %c0_i32_3 = arith.constant 0 : i32
    %16 = arith.cmpi slt, %9, %c0_i32_3 : i32
    %17 = vector.broadcast %16 : i1 to vector<32x128xi1>
    %18 = vector.broadcast %17 : vector<32x128xi1> to vector<32x128xi1>
    %19 = arith.xori %15, %18 : vector<32x128xi1>
    %20 = arith.andi %19, %13 : vector<32x128xi1>
    %21 = vector.broadcast %9 : i32 to vector<32x128xi32>
    %22 = arith.addi %11, %21 : vector<32x128xi32>
    %23 = arith.select %20, %22, %11 : vector<32x128xi1>, vector<32x128xi32>
    %c0_i32_4 = arith.constant 0 : i32
    %24 = vector.broadcast %c0_i32_4 : i32 to vector<32x128xi32>
    %25 = arith.cmpi ne, %23, %24 : vector<32x128xi32>
    %26 = arith.extui %25 : vector<32x128xi1> to vector<32x128xi32>
    %27 = arith.sitofp %26 : vector<32x128xi32> to vector<32x128xf32>
    %c15_i32 = arith.constant 15 : i32
    %28 = vector.broadcast %c15_i32 : i32 to vector<32x128xi32>
    %29 = arith.cmpi ne, %23, %28 : vector<32x128xi32>
    %30 = arith.extui %29 : vector<32x128xi1> to vector<32x128xi32>
    %31 = arith.sitofp %30 : vector<32x128xi32> to vector<32x128xf32>
    %c1_i32_5 = arith.constant 1 : i32
    %32 = tpu.dynamic_rotate %6 by %c1_i32_5 dim 0 : vector<32x128xf32>, i32 -> vector<32x128xf32>
    %33 = arith.mulf %32, %27 : vector<32x128xf32>
    %c31_i32 = arith.constant 31 : i32
    %34 = tpu.dynamic_rotate %6 by %c31_i32 dim 0 : vector<32x128xf32>, i32 -> vector<32x128xf32>
    %35 = arith.mulf %34, %31 : vector<32x128xf32>
    %36 = tpu.concatenate %33, %6, %35 in 1 : vector<32x128xf32>, vector<32x128xf32>, vector<32x128xf32> -> vector<32x384xf32>
    %37 = arith.truncf %36 : vector<32x384xf32> to vector<32x384xbf16>
    %c1_i32_6 = arith.constant 1 : i32
    %38 = tpu.dynamic_rotate %6 by %c1_i32_6 dim 0 : vector<32x128xf32>, i32 -> vector<32x128xf32>
    %39 = arith.mulf %38, %27 : vector<32x128xf32>
    %c31_i32_7 = arith.constant 31 : i32
    %40 = tpu.dynamic_rotate %6 by %c31_i32_7 dim 0 : vector<32x128xf32>, i32 -> vector<32x128xf32>
    %41 = arith.mulf %40, %31 : vector<32x128xf32>
    %42 = tpu.concatenate %39, %6, %41 in 1 : vector<32x128xf32>, vector<32x128xf32>, vector<32x128xf32> -> vector<32x384xf32>
    %43 = arith.truncf %42 : vector<32x384xf32> to vector<32x384xbf16>
    %c0_8 = arith.constant 0 : index
    %c0_9 = arith.constant 0 : index
    %c0_10 = arith.constant 0 : index
    %44 = vector.load %arg1[%c0_8, %c0_9, %c0_10] : memref<9x384x128xbf16, #tpu.memory_space<vmem>>, vector<1x384x128xbf16>
    %45 = vector.shape_cast %44 : vector<1x384x128xbf16> to vector<384x128xbf16>
    %cst_11 = arith.constant dense<0.000000e+00> : vector<32x128xf32>
    %46 = tpu.matmul %43, %45, %cst_11 {dimension_numbers = #tpu.dot_dimension_numbers<[1], [0], [0], [1], [0, 0, 1, 1], [], []>} : vector<32x384xbf16>, vector<384x128xbf16>, vector<32x128xf32> -> vector<32x128xf32>
    %c0_12 = arith.constant 0 : index
    %c0_13 = arith.constant 0 : index
    %c0_14 = arith.constant 0 : index
    %47 = vector.load %arg2[%c0_12, %c0_13, %c0_14] : memref<9x1x128xf32, #tpu.memory_space<vmem>>, vector<1x1x128xf32>
    %48 = vector.shape_cast %47 : vector<1x1x128xf32> to vector<1x128xf32>
    %49 = vector.broadcast %48 : vector<1x128xf32> to vector<32x128xf32>
    %50 = arith.addf %46, %49 : vector<32x128xf32>
    %cst_15 = arith.constant 0.000000e+00 : f32
    %51 = vector.broadcast %cst_15 : f32 to vector<32x128xf32>
    %52 = arith.maximumf %50, %51 : vector<32x128xf32>
    %c1_i32_16 = arith.constant 1 : i32
    %53 = tpu.dynamic_rotate %52 by %c1_i32_16 dim 0 : vector<32x128xf32>, i32 -> vector<32x128xf32>
    %54 = arith.mulf %53, %27 : vector<32x128xf32>
    %c31_i32_17 = arith.constant 31 : i32
    %55 = tpu.dynamic_rotate %52 by %c31_i32_17 dim 0 : vector<32x128xf32>, i32 -> vector<32x128xf32>
    %56 = arith.mulf %55, %31 : vector<32x128xf32>
    %57 = tpu.concatenate %54, %52, %56 in 1 : vector<32x128xf32>, vector<32x128xf32>, vector<32x128xf32> -> vector<32x384xf32>
    %58 = arith.truncf %57 : vector<32x384xf32> to vector<32x384xbf16>
    %c1 = arith.constant 1 : index
    %c0_18 = arith.constant 0 : index
    %c0_19 = arith.constant 0 : index
    %59 = vector.load %arg1[%c1, %c0_18, %c0_19] : memref<9x384x128xbf16, #tpu.memory_space<vmem>>, vector<1x384x128xbf16>
    %60 = vector.shape_cast %59 : vector<1x384x128xbf16> to vector<384x128xbf16>
    %cst_20 = arith.constant dense<0.000000e+00> : vector<32x128xf32>
    %61 = tpu.matmul %58, %60, %cst_20 {dimension_numbers = #tpu.dot_dimension_numbers<[1], [0], [0], [1], [0, 0, 1, 1], [], []>} : vector<32x384xbf16>, vector<384x128xbf16>, vector<32x128xf32> -> vector<32x128xf32>
    %c1_21 = arith.constant 1 : index
    %c0_22 = arith.constant 0 : index
    %c0_23 = arith.constant 0 : index
    %62 = vector.load %arg2[%c1_21, %c0_22, %c0_23] : memref<9x1x128xf32, #tpu.memory_space<vmem>>, vector<1x1x128xf32>
    %63 = vector.shape_cast %62 : vector<1x1x128xf32> to vector<1x128xf32>
    %64 = vector.broadcast %63 : vector<1x128xf32> to vector<32x128xf32>
    %65 = arith.addf %61, %64 : vector<32x128xf32>
    %66 = arith.addf %6, %65 : vector<32x128xf32>
    %c1_i32_24 = arith.constant 1 : i32
    %67 = tpu.dynamic_rotate %66 by %c1_i32_24 dim 0 : vector<32x128xf32>, i32 -> vector<32x128xf32>
    %68 = arith.mulf %67, %27 : vector<32x128xf32>
    %c31_i32_25 = arith.constant 31 : i32
    %69 = tpu.dynamic_rotate %66 by %c31_i32_25 dim 0 : vector<32x128xf32>, i32 -> vector<32x128xf32>
    %70 = arith.mulf %69, %31 : vector<32x128xf32>
    %71 = tpu.concatenate %68, %66, %70 in 1 : vector<32x128xf32>, vector<32x128xf32>, vector<32x128xf32> -> vector<32x384xf32>
    %72 = arith.truncf %71 : vector<32x384xf32> to vector<32x384xbf16>
    %c2 = arith.constant 2 : index
    %c0_26 = arith.constant 0 : index
    %c0_27 = arith.constant 0 : index
    %73 = vector.load %arg1[%c2, %c0_26, %c0_27] : memref<9x384x128xbf16, #tpu.memory_space<vmem>>, vector<1x384x128xbf16>
    %74 = vector.shape_cast %73 : vector<1x384x128xbf16> to vector<384x128xbf16>
    %cst_28 = arith.constant dense<0.000000e+00> : vector<32x128xf32>
    %75 = tpu.matmul %72, %74, %cst_28 {dimension_numbers = #tpu.dot_dimension_numbers<[1], [0], [0], [1], [0, 0, 1, 1], [], []>} : vector<32x384xbf16>, vector<384x128xbf16>, vector<32x128xf32> -> vector<32x128xf32>
    %c2_29 = arith.constant 2 : index
    %c0_30 = arith.constant 0 : index
    %c0_31 = arith.constant 0 : index
    %76 = vector.load %arg2[%c2_29, %c0_30, %c0_31] : memref<9x1x128xf32, #tpu.memory_space<vmem>>, vector<1x1x128xf32>
    %77 = vector.shape_cast %76 : vector<1x1x128xf32> to vector<1x128xf32>
    %78 = vector.broadcast %77 : vector<1x128xf32> to vector<32x128xf32>
    %79 = arith.addf %75, %78 : vector<32x128xf32>
    %cst_32 = arith.constant 0.000000e+00 : f32
    %80 = vector.broadcast %cst_32 : f32 to vector<32x128xf32>
    %81 = arith.maximumf %79, %80 : vector<32x128xf32>
    %c1_i32_33 = arith.constant 1 : i32
    %82 = tpu.dynamic_rotate %81 by %c1_i32_33 dim 0 : vector<32x128xf32>, i32 -> vector<32x128xf32>
    %83 = arith.mulf %82, %27 : vector<32x128xf32>
    %c31_i32_34 = arith.constant 31 : i32
    %84 = tpu.dynamic_rotate %81 by %c31_i32_34 dim 0 : vector<32x128xf32>, i32 -> vector<32x128xf32>
    %85 = arith.mulf %84, %31 : vector<32x128xf32>
    %86 = tpu.concatenate %83, %81, %85 in 1 : vector<32x128xf32>, vector<32x128xf32>, vector<32x128xf32> -> vector<32x384xf32>
    %87 = arith.truncf %86 : vector<32x384xf32> to vector<32x384xbf16>
    %c3 = arith.constant 3 : index
    %c0_35 = arith.constant 0 : index
    %c0_36 = arith.constant 0 : index
    %88 = vector.load %arg1[%c3, %c0_35, %c0_36] : memref<9x384x128xbf16, #tpu.memory_space<vmem>>, vector<1x384x128xbf16>
    %89 = vector.shape_cast %88 : vector<1x384x128xbf16> to vector<384x128xbf16>
    %cst_37 = arith.constant dense<0.000000e+00> : vector<32x128xf32>
    %90 = tpu.matmul %87, %89, %cst_37 {dimension_numbers = #tpu.dot_dimension_numbers<[1], [0], [0], [1], [0, 0, 1, 1], [], []>} : vector<32x384xbf16>, vector<384x128xbf16>, vector<32x128xf32> -> vector<32x128xf32>
    %c3_38 = arith.constant 3 : index
    %c0_39 = arith.constant 0 : index
    %c0_40 = arith.constant 0 : index
    %91 = vector.load %arg2[%c3_38, %c0_39, %c0_40] : memref<9x1x128xf32, #tpu.memory_space<vmem>>, vector<1x1x128xf32>
    %92 = vector.shape_cast %91 : vector<1x1x128xf32> to vector<1x128xf32>
    %93 = vector.broadcast %92 : vector<1x128xf32> to vector<32x128xf32>
    %94 = arith.addf %90, %93 : vector<32x128xf32>
    %95 = arith.addf %66, %94 : vector<32x128xf32>
    %c1_i32_41 = arith.constant 1 : i32
    %96 = tpu.dynamic_rotate %95 by %c1_i32_41 dim 0 : vector<32x128xf32>, i32 -> vector<32x128xf32>
    %97 = arith.mulf %96, %27 : vector<32x128xf32>
    %c31_i32_42 = arith.constant 31 : i32
    %98 = tpu.dynamic_rotate %95 by %c31_i32_42 dim 0 : vector<32x128xf32>, i32 -> vector<32x128xf32>
    %99 = arith.mulf %98, %31 : vector<32x128xf32>
    %100 = tpu.concatenate %97, %95, %99 in 1 : vector<32x128xf32>, vector<32x128xf32>, vector<32x128xf32> -> vector<32x384xf32>
    %101 = arith.truncf %100 : vector<32x384xf32> to vector<32x384xbf16>
    %c4 = arith.constant 4 : index
    %c0_43 = arith.constant 0 : index
    %c0_44 = arith.constant 0 : index
    %102 = vector.load %arg1[%c4, %c0_43, %c0_44] : memref<9x384x128xbf16, #tpu.memory_space<vmem>>, vector<1x384x128xbf16>
    %103 = vector.shape_cast %102 : vector<1x384x128xbf16> to vector<384x128xbf16>
    %cst_45 = arith.constant dense<0.000000e+00> : vector<32x128xf32>
    %104 = tpu.matmul %101, %103, %cst_45 {dimension_numbers = #tpu.dot_dimension_numbers<[1], [0], [0], [1], [0, 0, 1, 1], [], []>} : vector<32x384xbf16>, vector<384x128xbf16>, vector<32x128xf32> -> vector<32x128xf32>
    %c4_46 = arith.constant 4 : index
    %c0_47 = arith.constant 0 : index
    %c0_48 = arith.constant 0 : index
    %105 = vector.load %arg2[%c4_46, %c0_47, %c0_48] : memref<9x1x128xf32, #tpu.memory_space<vmem>>, vector<1x1x128xf32>
    %106 = vector.shape_cast %105 : vector<1x1x128xf32> to vector<1x128xf32>
    %107 = vector.broadcast %106 : vector<1x128xf32> to vector<32x128xf32>
    %108 = arith.addf %104, %107 : vector<32x128xf32>
    %cst_49 = arith.constant 0.000000e+00 : f32
    %109 = vector.broadcast %cst_49 : f32 to vector<32x128xf32>
    %110 = arith.maximumf %108, %109 : vector<32x128xf32>
    %c1_i32_50 = arith.constant 1 : i32
    %111 = tpu.dynamic_rotate %110 by %c1_i32_50 dim 0 : vector<32x128xf32>, i32 -> vector<32x128xf32>
    %112 = arith.mulf %111, %27 : vector<32x128xf32>
    %c31_i32_51 = arith.constant 31 : i32
    %113 = tpu.dynamic_rotate %110 by %c31_i32_51 dim 0 : vector<32x128xf32>, i32 -> vector<32x128xf32>
    %114 = arith.mulf %113, %31 : vector<32x128xf32>
    %115 = tpu.concatenate %112, %110, %114 in 1 : vector<32x128xf32>, vector<32x128xf32>, vector<32x128xf32> -> vector<32x384xf32>
    %116 = arith.truncf %115 : vector<32x384xf32> to vector<32x384xbf16>
    %c5 = arith.constant 5 : index
    %c0_52 = arith.constant 0 : index
    %c0_53 = arith.constant 0 : index
    %117 = vector.load %arg1[%c5, %c0_52, %c0_53] : memref<9x384x128xbf16, #tpu.memory_space<vmem>>, vector<1x384x128xbf16>
    %118 = vector.shape_cast %117 : vector<1x384x128xbf16> to vector<384x128xbf16>
    %cst_54 = arith.constant dense<0.000000e+00> : vector<32x128xf32>
    %119 = tpu.matmul %116, %118, %cst_54 {dimension_numbers = #tpu.dot_dimension_numbers<[1], [0], [0], [1], [0, 0, 1, 1], [], []>} : vector<32x384xbf16>, vector<384x128xbf16>, vector<32x128xf32> -> vector<32x128xf32>
    %c5_55 = arith.constant 5 : index
    %c0_56 = arith.constant 0 : index
    %c0_57 = arith.constant 0 : index
    %120 = vector.load %arg2[%c5_55, %c0_56, %c0_57] : memref<9x1x128xf32, #tpu.memory_space<vmem>>, vector<1x1x128xf32>
    %121 = vector.shape_cast %120 : vector<1x1x128xf32> to vector<1x128xf32>
    %122 = vector.broadcast %121 : vector<1x128xf32> to vector<32x128xf32>
    %123 = arith.addf %119, %122 : vector<32x128xf32>
    %124 = arith.addf %95, %123 : vector<32x128xf32>
    %c1_i32_58 = arith.constant 1 : i32
    %125 = tpu.dynamic_rotate %124 by %c1_i32_58 dim 0 : vector<32x128xf32>, i32 -> vector<32x128xf32>
    %126 = arith.mulf %125, %27 : vector<32x128xf32>
    %c31_i32_59 = arith.constant 31 : i32
    %127 = tpu.dynamic_rotate %124 by %c31_i32_59 dim 0 : vector<32x128xf32>, i32 -> vector<32x128xf32>
    %128 = arith.mulf %127, %31 : vector<32x128xf32>
    %129 = tpu.concatenate %126, %124, %128 in 1 : vector<32x128xf32>, vector<32x128xf32>, vector<32x128xf32> -> vector<32x384xf32>
    %130 = arith.truncf %129 : vector<32x384xf32> to vector<32x384xbf16>
    %c6 = arith.constant 6 : index
    %c0_60 = arith.constant 0 : index
    %c0_61 = arith.constant 0 : index
    %131 = vector.load %arg1[%c6, %c0_60, %c0_61] : memref<9x384x128xbf16, #tpu.memory_space<vmem>>, vector<1x384x128xbf16>
    %132 = vector.shape_cast %131 : vector<1x384x128xbf16> to vector<384x128xbf16>
    %cst_62 = arith.constant dense<0.000000e+00> : vector<32x128xf32>
    %133 = tpu.matmul %130, %132, %cst_62 {dimension_numbers = #tpu.dot_dimension_numbers<[1], [0], [0], [1], [0, 0, 1, 1], [], []>} : vector<32x384xbf16>, vector<384x128xbf16>, vector<32x128xf32> -> vector<32x128xf32>
    %c6_63 = arith.constant 6 : index
    %c0_64 = arith.constant 0 : index
    %c0_65 = arith.constant 0 : index
    %134 = vector.load %arg2[%c6_63, %c0_64, %c0_65] : memref<9x1x128xf32, #tpu.memory_space<vmem>>, vector<1x1x128xf32>
    %135 = vector.shape_cast %134 : vector<1x1x128xf32> to vector<1x128xf32>
    %136 = vector.broadcast %135 : vector<1x128xf32> to vector<32x128xf32>
    %137 = arith.addf %133, %136 : vector<32x128xf32>
    %cst_66 = arith.constant 0.000000e+00 : f32
    %138 = vector.broadcast %cst_66 : f32 to vector<32x128xf32>
    %139 = arith.maximumf %137, %138 : vector<32x128xf32>
    %c1_i32_67 = arith.constant 1 : i32
    %140 = tpu.dynamic_rotate %139 by %c1_i32_67 dim 0 : vector<32x128xf32>, i32 -> vector<32x128xf32>
    %141 = arith.mulf %140, %27 : vector<32x128xf32>
    %c31_i32_68 = arith.constant 31 : i32
    %142 = tpu.dynamic_rotate %139 by %c31_i32_68 dim 0 : vector<32x128xf32>, i32 -> vector<32x128xf32>
    %143 = arith.mulf %142, %31 : vector<32x128xf32>
    %144 = tpu.concatenate %141, %139, %143 in 1 : vector<32x128xf32>, vector<32x128xf32>, vector<32x128xf32> -> vector<32x384xf32>
    %145 = arith.truncf %144 : vector<32x384xf32> to vector<32x384xbf16>
    %c7 = arith.constant 7 : index
    %c0_69 = arith.constant 0 : index
    %c0_70 = arith.constant 0 : index
    %146 = vector.load %arg1[%c7, %c0_69, %c0_70] : memref<9x384x128xbf16, #tpu.memory_space<vmem>>, vector<1x384x128xbf16>
    %147 = vector.shape_cast %146 : vector<1x384x128xbf16> to vector<384x128xbf16>
    %cst_71 = arith.constant dense<0.000000e+00> : vector<32x128xf32>
    %148 = tpu.matmul %145, %147, %cst_71 {dimension_numbers = #tpu.dot_dimension_numbers<[1], [0], [0], [1], [0, 0, 1, 1], [], []>} : vector<32x384xbf16>, vector<384x128xbf16>, vector<32x128xf32> -> vector<32x128xf32>
    %c7_72 = arith.constant 7 : index
    %c0_73 = arith.constant 0 : index
    %c0_74 = arith.constant 0 : index
    %149 = vector.load %arg2[%c7_72, %c0_73, %c0_74] : memref<9x1x128xf32, #tpu.memory_space<vmem>>, vector<1x1x128xf32>
    %150 = vector.shape_cast %149 : vector<1x1x128xf32> to vector<1x128xf32>
    %151 = vector.broadcast %150 : vector<1x128xf32> to vector<32x128xf32>
    %152 = arith.addf %148, %151 : vector<32x128xf32>
    %153 = arith.addf %124, %152 : vector<32x128xf32>
    %154 = vector.extract_strided_slice %153 {offsets = [0, 0], sizes = [16, 128], strides = [1, 1]} : vector<32x128xf32> to vector<16x128xf32>
    %c0_75 = arith.constant 0 : index
    %c0_76 = arith.constant 0 : index
    %155 = vector.load %arg5[%c0_75, %c0_76] : memref<32x16xf32, #tpu.memory_space<vmem>>, vector<32x16xf32>
    %cst_77 = arith.constant dense<0.000000e+00> : vector<32x128xf32>
    %156 = tpu.matmul %155, %154, %cst_77 {dimension_numbers = #tpu.dot_dimension_numbers<[1], [0], [0], [1], [0, 0, 1, 1], [], []>} : vector<32x16xf32>, vector<16x128xf32>, vector<32x128xf32> -> vector<32x128xf32>
    %c0_78 = arith.constant 0 : index
    %c0_79 = arith.constant 0 : index
    %157 = vector.load %arg6[%c0_78, %c0_79] : memref<16x32xf32, #tpu.memory_space<vmem>>, vector<16x32xf32>
    %cst_80 = arith.constant dense<0.000000e+00> : vector<16x128xf32>
    %158 = tpu.matmul %157, %156, %cst_80 {dimension_numbers = #tpu.dot_dimension_numbers<[1], [0], [0], [1], [0, 0, 1, 1], [], []>} : vector<16x32xf32>, vector<32x128xf32>, vector<16x128xf32> -> vector<16x128xf32>
    %c0_81 = arith.constant 0 : index
    %c0_82 = arith.constant 0 : index
    %159 = vector.load %arg7[%c0_81, %c0_82] : memref<16x128xf32, #tpu.memory_space<vmem>>, vector<16x128xf32>
    %160 = arith.addf %158, %159 : vector<16x128xf32>
    %cst_83 = arith.constant 0.000000e+00 : f32
    %161 = vector.broadcast %cst_83 : f32 to vector<16x128xf32>
    %162 = arith.maximumf %160, %161 : vector<16x128xf32>
    %163 = vector.extract_strided_slice %153 {offsets = [16, 0], sizes = [16, 128], strides = [1, 1]} : vector<32x128xf32> to vector<16x128xf32>
    %c0_84 = arith.constant 0 : index
    %c0_85 = arith.constant 0 : index
    %164 = vector.load %arg5[%c0_84, %c0_85] : memref<32x16xf32, #tpu.memory_space<vmem>>, vector<32x16xf32>
    %cst_86 = arith.constant dense<0.000000e+00> : vector<32x128xf32>
    %165 = tpu.matmul %164, %163, %cst_86 {dimension_numbers = #tpu.dot_dimension_numbers<[1], [0], [0], [1], [0, 0, 1, 1], [], []>} : vector<32x16xf32>, vector<16x128xf32>, vector<32x128xf32> -> vector<32x128xf32>
    %c0_87 = arith.constant 0 : index
    %c0_88 = arith.constant 0 : index
    %166 = vector.load %arg6[%c0_87, %c0_88] : memref<16x32xf32, #tpu.memory_space<vmem>>, vector<16x32xf32>
    %cst_89 = arith.constant dense<0.000000e+00> : vector<16x128xf32>
    %167 = tpu.matmul %166, %165, %cst_89 {dimension_numbers = #tpu.dot_dimension_numbers<[1], [0], [0], [1], [0, 0, 1, 1], [], []>} : vector<16x32xf32>, vector<32x128xf32>, vector<16x128xf32> -> vector<16x128xf32>
    %c0_90 = arith.constant 0 : index
    %c0_91 = arith.constant 0 : index
    %168 = vector.load %arg7[%c0_90, %c0_91] : memref<16x128xf32, #tpu.memory_space<vmem>>, vector<16x128xf32>
    %169 = arith.addf %167, %168 : vector<16x128xf32>
    %cst_92 = arith.constant 0.000000e+00 : f32
    %170 = vector.broadcast %cst_92 : f32 to vector<16x128xf32>
    %171 = arith.maximumf %169, %170 : vector<16x128xf32>
    %172 = tpu.concatenate %162, %171 in 0 : vector<16x128xf32>, vector<16x128xf32> -> vector<32x128xf32>
    %173 = arith.addf %153, %172 : vector<32x128xf32>
    %c1_i32_93 = arith.constant 1 : i32
    %174 = tpu.dynamic_rotate %173 by %c1_i32_93 dim 0 : vector<32x128xf32>, i32 -> vector<32x128xf32>
    %175 = arith.mulf %174, %27 : vector<32x128xf32>
    %c31_i32_94 = arith.constant 31 : i32
    %176 = tpu.dynamic_rotate %173 by %c31_i32_94 dim 0 : vector<32x128xf32>, i32 -> vector<32x128xf32>
    %177 = arith.mulf %176, %31 : vector<32x128xf32>
    %178 = tpu.concatenate %175, %173, %177 in 1 : vector<32x128xf32>, vector<32x128xf32>, vector<32x128xf32> -> vector<32x384xf32>
    %179 = arith.truncf %178 : vector<32x384xf32> to vector<32x384xbf16>
    %c8 = arith.constant 8 : index
    %c0_95 = arith.constant 0 : index
    %c0_96 = arith.constant 0 : index
    %180 = vector.load %arg1[%c8, %c0_95, %c0_96] : memref<9x384x128xbf16, #tpu.memory_space<vmem>>, vector<1x384x128xbf16>
    %181 = vector.shape_cast %180 : vector<1x384x128xbf16> to vector<384x128xbf16>
    %cst_97 = arith.constant dense<0.000000e+00> : vector<32x128xf32>
    %182 = tpu.matmul %179, %181, %cst_97 {dimension_numbers = #tpu.dot_dimension_numbers<[1], [0], [0], [1], [0, 0, 1, 1], [], []>} : vector<32x384xbf16>, vector<384x128xbf16>, vector<32x128xf32> -> vector<32x128xf32>
    %c8_98 = arith.constant 8 : index
    %c0_99 = arith.constant 0 : index
    %c0_100 = arith.constant 0 : index
    %183 = vector.load %arg2[%c8_98, %c0_99, %c0_100] : memref<9x1x128xf32, #tpu.memory_space<vmem>>, vector<1x1x128xf32>
    %184 = vector.shape_cast %183 : vector<1x1x128xf32> to vector<1x128xf32>
    %185 = vector.broadcast %184 : vector<1x128xf32> to vector<32x128xf32>
    %186 = arith.addf %182, %185 : vector<32x128xf32>
    %cst_101 = arith.constant 0.000000e+00 : f32
    %187 = vector.broadcast %cst_101 : f32 to vector<32x128xf32>
    %188 = arith.maximumf %186, %187 : vector<32x128xf32>
    %c1_i32_102 = arith.constant 1 : i32
    %189 = tpu.dynamic_rotate %188 by %c1_i32_102 dim 0 : vector<32x128xf32>, i32 -> vector<32x128xf32>
    %190 = arith.mulf %189, %27 : vector<32x128xf32>
    %c31_i32_103 = arith.constant 31 : i32
    %191 = tpu.dynamic_rotate %188 by %c31_i32_103 dim 0 : vector<32x128xf32>, i32 -> vector<32x128xf32>
    %192 = arith.mulf %191, %31 : vector<32x128xf32>
    %193 = tpu.concatenate %190, %188, %192 in 1 : vector<32x128xf32>, vector<32x128xf32>, vector<32x128xf32> -> vector<32x384xf32>
    %194 = arith.truncf %193 : vector<32x384xf32> to vector<32x384xbf16>
    %195 = tpu.concatenate %37, %194 in 1 : vector<32x384xbf16>, vector<32x384xbf16> -> vector<32x768xbf16>
    %c0_104 = arith.constant 0 : index
    %c0_105 = arith.constant 0 : index
    %196 = vector.load %arg3[%c0_104, %c0_105] : memref<768x128xbf16, #tpu.memory_space<vmem>>, vector<768x128xbf16>
    %cst_106 = arith.constant dense<0.000000e+00> : vector<32x128xf32>
    %197 = tpu.matmul %195, %196, %cst_106 {dimension_numbers = #tpu.dot_dimension_numbers<[1], [0], [0], [1], [0, 0, 1, 1], [], []>} : vector<32x768xbf16>, vector<768x128xbf16>, vector<32x128xf32> -> vector<32x128xf32>
    %c0_107 = arith.constant 0 : index
    %c0_108 = arith.constant 0 : index
    %198 = vector.load %arg4[%c0_107, %c0_108] : memref<1x128xf32, #tpu.memory_space<vmem>>, vector<1x128xf32>
    %199 = vector.broadcast %198 : vector<1x128xf32> to vector<32x128xf32>
    %200 = arith.addf %197, %199 : vector<32x128xf32>
    %c0_109 = arith.constant 0 : index
    %c0_110 = arith.constant 0 : index
    %201 = vector.load %arg8[%c0_109, %c0_110] : memref<32x128xf32, #tpu.memory_space<vmem>>, vector<32x128xf32>
    %202 = arith.addf %200, %201 : vector<32x128xf32>
    %c0_111 = arith.constant 0 : index
    %c0_112 = arith.constant 0 : index
    %203 = vector.load %arg9[%c0_111, %c0_112] : memref<1x128xf32, #tpu.memory_space<vmem>>, vector<1x128xf32>
    %204 = vector.broadcast %203 : vector<1x128xf32> to vector<32x128xf32>
    %205 = arith.mulf %202, %204 : vector<32x128xf32>
    %c0_113 = arith.constant 0 : index
    %c0_114 = arith.constant 0 : index
    %206 = vector.load %arg10[%c0_113, %c0_114] : memref<1x128xf32, #tpu.memory_space<vmem>>, vector<1x128xf32>
    %207 = vector.broadcast %206 : vector<1x128xf32> to vector<32x128xf32>
    %208 = arith.addf %205, %207 : vector<32x128xf32>
    %c0_115 = arith.constant 0 : index
    %c0_116 = arith.constant 0 : index
    %209 = vector.load %arg11[%c0_115, %c0_116] : memref<32x128xf32, #tpu.memory_space<vmem>>, vector<32x128xf32>
    tpu.vector_store %arg11[%c0_115, %c0_116], %208 {strides = array<i32>} : memref<32x128xf32, #tpu.memory_space<vmem>>, vector<32x128xf32>,
    return
  }
}

</mosaic_0001>

<bundles_post_ra>
// kernel: tpu_custom_call.1
= control target key start
LH: loop header
LB: loop body
LE: loop exit
PB: predicated region body
PF: predicated region fallthrough
CT: control target
= control target key end

     0   :  { %16 = vsyncpa [#allocation3], 0  ;;  %s5578_s0 = inlined_call_operand.vmem [shape: f32[32,7], index: 0, kind: input, shape index: {}]   ;;  %s5579_s1 = inlined_call_operand.hbm [shape: bf16[9,384,128], index: 1, kind: input, shape index: {}]   ;;  %s5580_s2 = inlined_call_operand.vmem [shape: f32[9,1,128], index: 2, kind: input, shape index: {}]   ;;  %s5581_s3 = inlined_call_operand.hbm [shape: bf16[768,128], index: 3, kind: input, shape index: {}]   ;;  %s5582_s4 = inlined_call_operand.vmem [shape: f32[1,128], index: 4, kind: input, shape index: {}]   ;;  %s5583_s5 = inlined_call_operand.vmem [shape: f32[32,16], index: 5, kind: input, shape index: {}]   ;;  %s5584_s6 = inlined_call_operand.vmem [shape: f32[16,32], index: 6, kind: input, shape index: {}]   ;;  %s5585_s7 = inlined_call_operand.vmem [shape: f32[16,128], index: 7, kind: input, shape index: {}]   ;;  %s5586_s8 = inlined_call_operand.vmem [shape: f32[32,128], index: 8, kind: input, shape index: {}]   ;;  %s5587_s9 = inlined_call_operand.vmem [shape: f32[1,128], index: 9, kind: input, shape index: {}]   ;;  %s5588_s10 = inlined_call_operand.vmem [shape: f32[1,128], index: 10, kind: input, shape index: {}]   ;;  %s5589_s11 = inlined_call_operand.hbm [shape: f32[32,128], index: 11, kind: output, shape index: {}]  }
   0x1   :  { %17 = vsyncpa [#allocation6], 0 }
   0x2   :  { %18 = vsyncpa [#allocation4], 0  ;;  %s25_s19 = sshll.u32 %s5579_s1, 4  ;;  %s5048_s20 = smov [#allocation2]   ;;  %s26_s19 = int_to_ptr.hbm [resolvable:$true] %s25_s19 }
   0x3   :  { %s27_s21 = sshll.u32 %s5048_s20, 4  ;;  %s40_s24 = sshll.u32 %s5581_s3, 4  ;;  %s28_s21 = int_to_ptr.vmem [resolvable:$true] %s27_s21  ;;  %s41_s24 = int_to_ptr.hbm [resolvable:$true] %s40_s24 }
   0x4   :  { %s5049_s25 = smov 64   ;;  %s5050_s26 = smov 4  }
   0x5   :  { %33 = dma.hbm_to_vmem [thread:$0]  %s26_s19, 27648, %s28_s21, [#allocation3], %s5049_s25, %s5049_s25, %s5050_s26  }
   0x6   :  { %s5051_s27 = smov [#allocation5]  }
   0x7   :  { %s42_s28 = sshll.u32 %s5051_s27, 4  ;;  %s43_s28 = int_to_ptr.vmem [resolvable:$true] %s42_s28 }
   0x8   :  { %48 = dma.hbm_to_vmem [thread:$0]  %s41_s24, 6144, %s43_s28, [#allocation6], %s5049_s25, %s5049_s25, %s5050_s26  }
   0x9   :  { %5042 = dma.done.wait [#allocation3], 27648  }
   0xa   :  { %5043 = vsyncadd [#allocation3], 4294939648 }
   0xb   :  { %5044 = dma.done.wait [#allocation6], 6144  }
   0xc   :  { %5045 = vsyncadd [#allocation6], 4294961152  ;;  %v71_v0 = vlaneseq  ;;  %vm95_vm0 = vcmask 1046528   ;;  %v5052_v6 = vmov 0.0   ;;  %vm82_vm2 = vcmask 56320   ;;  %v78_v12 = vld [vmem:[%s5578_s0] sm:$0xff] }
   0xd   :  { %v4701_v14 = vld [vmem:[#allocation2 + $0xb8] sm:$0xff]  ;;  %v79_v18 = vld [vmem:[%s5578_s0 + $0x8] sm:$0xff]  ;;  %v80_v19 = vld [vmem:[%s5578_s0 + $0x10] sm:$0xff]  ;;  %vm2553_vm9 = vcmask 130048   ;;  %vm2599_vm10 = vcmask 261120   ;;  %s5053_s13 = smov [#allocation7]  }
   0xe   :  { %v5122_v1 = vshrl.u32 %v71_v0, 7  ;;  %v74_v2 = vand.u32 127, %v71_v0  ;;  %503 = vmatpush.bf16.msra.mxu3 %v4701_v14  ;;  %v81_v20 = vld [vmem:[%s5578_s0 + $0x18] sm:$0xff]  ;;  %v4700_v21 = vld [vmem:[#allocation2 + $0xb0] sm:$0xff]  ;;  %v4699_v24 = vld [vmem:[#allocation2 + $0xa8] sm:$0xff]  ;;  %s3576_s14 = sshll.u32 %s5053_s13, 4  ;;  %s3577_s14 = int_to_ptr.vmem [resolvable:$true] %s3576_s14 }
   0xf   :  { %v4685_v22 = vld [vmem:[#allocation2 + $0x38] sm:$0xff]  ;;  %v4684_v25 = vld [vmem:[#allocation2 + $0x30] sm:$0xff]  ;;  %v4698_v27 = vld [vmem:[#allocation2 + $0xa0] sm:$0xff]  ;;  %s3578_s16 = sshll.u32 %s5589_s11, 4  ;;  %s5054_s17 = smov 128   ;;  %s3579_s16 = int_to_ptr.hbm [resolvable:$true] %s3578_s16 }
  0x10   :  { %vm75_vm1 = vcmp.eq.s32.totalorder %v5122_v1, %v74_v2  ;;  %v128_v3 = vadd.s32 8, %v5122_v1  ;;  %v129_v4 = vadd.s32 16, %v5122_v1  ;;  %v130_v5 = vadd.s32 24, %v5122_v1  ;;  %v4693_v23 = vld [vmem:[#allocation2 + $0x78] sm:$0xff]  ;;  %465 = vmatpush.bf16.msra.mxu1 %v4685_v22  ;;  %v4692_v26 = vld [vmem:[#allocation2 + $0x70] sm:$0xff]  ;;  %v4683_v28 = vld [vmem:[#allocation2 + $0x28] sm:$0xff] }
  0x11   :  { %v3592_v7 = vsel %vm75_vm1, 1.0, %v5052_v6  ;;  %v135_v8 = vand.u32 15, %v5122_v1  ;;  %484 = vmatpush.bf16.msra.mxu2 %v4693_v23  ;;  %v4691_v29 = vld [vmem:[#allocation2 + $0x68] sm:$0xff]  ;;  %v4697_v30 = vld [vmem:[#allocation2 + $0x98] sm:$0xff]  ;;  %v4682_v31 = vld [vmem:[#allocation2 + $0x20] sm:$0xff]  ;;  %vm220_vm7 = vcmp.lt.s32.totalorder %v5122_v1, 7 }
  0x12   :  { %3593 = vmatpush.msk.msra.mxu0 %vm95_vm0, %v3592_v7  ;;  %v142_v9 = vand.u32 15, %v128_v3  ;;  %v149_v10 = vand.u32 15, %v129_v4  ;;  %v156_v11 = vand.u32 15, %v130_v5  ;;  %504 = vmatpush.bf16.msra.mxu3 %v4700_v21  ;;  %v4690_v32 = vld [vmem:[#allocation2 + $0x60] sm:$0xff]  ;;  %v4696_v33 = vld [vmem:[#allocation2 + $0x90] sm:$0xff]  ;;  %v4681_v34 = vld [vmem:[#allocation2 + $0x18] sm:$0xff] }
  0x13   :  { %vm179_vm3 = vcmp.ne.s32.totalorder %v135_v8, 0  ;;  %3594 = vmatmul.msk.f32.vlgmr.msra.gmra.mxu0 %vm82_vm2, %v78_v12  ;;  %v4689_v35 = vld [vmem:[#allocation2 + $0x58] sm:$0xff]  ;;  %v4695_v36 = vld [vmem:[#allocation2 + $0x88] sm:$0xff]  ;;  %v4680_v37 = vld [vmem:[#allocation2 + $0x10] sm:$0xff]  ;;  %vm207_vm8 = vcmp.lt.s32.totalorder %v5122_v1, 1  ;;  %s5055_s18 = smov 8  }
  0x14   :  { %vm181_vm4 = vcmp.ne.s32.totalorder %v149_v10, 0  ;;  %v5132_v13 = vsel %vm179_vm3, 1.0, %v5052_v6  ;;  %vm192_vm5 = vcmp.ne.s32.totalorder %v142_v9, 15  ;;  %vm194_vm6 = vcmp.ne.s32.totalorder %v156_v11, 15  ;;  %466 = vmatpush.bf16.msra.mxu1 %v4684_v25  ;;  %v4688_v38 = vld [vmem:[#allocation2 + $0x50] sm:$0xff]  ;;  %v4694_v39 = vld [vmem:[#allocation2 + $0x80] sm:$0xff] }
  0x15   :  { %v5135_v15 = vsel %vm181_vm4, 1.0, %v5052_v6  ;;  %v5137_v16 = vsel %vm192_vm5, 1.0, %v5052_v6  ;;  %v5139_v17 = vsel %vm194_vm6, 1.0, %v5052_v6  ;;  %485 = vmatpush.bf16.msra.mxu2 %v4692_v26  ;;  %v4679_v40 = vld [vmem:[#allocation2 + $0x8] sm:$0xff]  ;;  %v4678_v42 = vld [vmem:[#allocation2] sm:$0xff]  ;;  %v4717_v54 = vld [vmem:[#allocation2 + $0x138] sm:$0xff] }
  0x16   :  { %505 = vmatpush.bf16.msra.mxu3 %v4699_v24  ;;  %v4687_v41 = vld [vmem:[#allocation2 + $0x48] sm:$0xff]  ;;  %v4686_v43 = vld [vmem:[#allocation2 + $0x40] sm:$0xff]  ;;  %v4716_v57 = vld [vmem:[#allocation2 + $0x130] sm:$0xff] }
  0x18   :  { %467 = vmatpush.bf16.msra.mxu1 %v4683_v28 }
  0x19   :  { %486 = vmatpush.bf16.msra.mxu2 %v4691_v29 }
  0x1a   :  { %506 = vmatpush.bf16.msra.mxu3 %v4698_v27 }
  0x1b   :  { %3595 = vmatmul.msk.f32.gmra.mxu0 %vm82_vm2, %v79_v18 }
  0x1c   :  { %468 = vmatpush.bf16.msra.mxu1 %v4682_v31 }
  0x1d   :  { %487 = vmatpush.bf16.msra.mxu2 %v4690_v32 }
  0x1e   :  { %507 = vmatpush.bf16.msra.mxu3 %v4697_v30 }
  0x20   :  { %469 = vmatpush.bf16.msra.mxu1 %v4681_v34 }
  0x21   :  { %488 = vmatpush.bf16.msra.mxu2 %v4689_v35 }
  0x22   :  { %508 = vmatpush.bf16.msra.mxu3 %v4696_v33 }
  0x23   :  { %3596 = vmatmul.msk.f32.gmra.mxu0 %vm82_vm2, %v80_v19 }
  0x24   :  { %470 = vmatpush.bf16.msra.mxu1 %v4680_v37  ;;  %v4715_v37 = vld [vmem:[#allocation2 + $0x128] sm:$0xff] }
  0x25   :  { %489 = vmatpush.bf16.msra.mxu2 %v4688_v38  ;;  %v4714_v38 = vld [vmem:[#allocation2 + $0x120] sm:$0xff] }
  0x26   :  { %509 = vmatpush.bf16.msra.mxu3 %v4695_v36 }
  0x28   :  { %471 = vmatpush.bf16.msra.mxu1 %v4679_v40  ;;  %v4713_v40 = vld [vmem:[#allocation2 + $0x118] sm:$0xff] }
  0x29   :  { %490 = vmatpush.bf16.msra.mxu2 %v4687_v41  ;;  %v4724_v41 = vld [vmem:[#allocation2 + $0x170] sm:$0xff] }
  0x2a   :  { %510 = vmatpush.bf16.msra.mxu3 %v4694_v39  ;;  %v4725_v39 = vld [vmem:[#allocation2 + $0x178] sm:$0xff] }
  0x2b   :  { %3597 = vmatmul.msk.f32.gmra.mxu0 %vm82_vm2, %v81_v20 }
  0x2c   :  { %472 = vmatpush.bf16.msra.mxu1 %v4678_v42  ;;  %v4712_v42 = vld [vmem:[#allocation2 + $0x110] sm:$0xff] }
  0x2d   :  { %491 = vmatpush.bf16.msra.mxu2 %v4686_v43  ;;  %v4709_v43 = vld [vmem:[#allocation2 + $0xf8] sm:$0xff] }
  0x2e   :  { %754 = vmatpush.bf16.msrb.mxu0 %v4709_v43 }
  0x30   :  { %773 = vmatpush.bf16.msrb.mxu1 %v4717_v54  ;;  %v4706_v54 = vld [vmem:[#allocation2 + $0xe0] sm:$0xff] }
  0x31   :  { %792 = vmatpush.bf16.msrb.mxu2 %v4725_v39 }
  0x34   :  { %774 = vmatpush.bf16.msrb.mxu1 %v4716_v57  ;;  %v4719_v57 = vld [vmem:[#allocation2 + $0x148] sm:$0xff] }
  0x35   :  { %793 = vmatpush.bf16.msrb.mxu2 %v4724_v41 }
  0x38   :  { %775 = vmatpush.bf16.msrb.mxu1 %v4715_v37 }
  0x3c   :  { %776 = vmatpush.bf16.msrb.mxu1 %v4714_v38 }
  0x40   :  { %777 = vmatpush.bf16.msrb.mxu1 %v4713_v40 }
  0x44   :  { %778 = vmatpush.bf16.msrb.mxu1 %v4712_v42 }
  0x90   :  { %v5153_v44 = vpop.f32.mrf.mxu0 }
  0x91   :  { %v216_v47 = vrot.slane %v5153_v44, 1  ;;  %v203_v58 = vrot.slane %v5153_v44, 7 }
  0x98   :  { %v5155_v45 = vpop.f32.mrf.mxu0 }
  0x99   :  { %v217_v46 = vrot.slane %v5155_v45, 1  ;;  %v204_v55 = vrot.slane %v5155_v45, 7 }
  0x9b   :  { %v223_v50 = vsel %vm220_vm7, %v216_v47, %v217_v46  ;;  %v210_v0 = vsel %vm207_vm8, %v203_v58, %v204_v55 }
  0x9c   :  { %v230_v53 = vpack.c.bf16 %v223_v50, %v223_v50  ;;  %v231_v6 = vpack.c.bf16 %v5155_v45, %v210_v0  ;;  %v4722_v50 = vld [vmem:[#allocation2 + $0x160] sm:$0xff] }
  0x9d   :  { %v4958_v0 = vld [vmem:[%s5580_s2] ss:$0 sm:$0xff] }
  0x9e   :  { %v299_v60 = vunpack.c.l.b16 %v230_v53  ;;  %v300_v10 = vunpack.c.l.b16 %v231_v6  ;;  %v301_v12 = vunpack.c.h.b16 %v231_v6  ;;  %v4721_v53 = vld [vmem:[#allocation2 + $0x158] sm:$0xff] }
  0xa0   :  { %v5160_v48 = vpop.f32.mrf.mxu0 }
  0xa1   :  { %v218_v49 = vrot.slane %v5160_v48, 1  ;;  %v205_v14 = vrot.slane %v5160_v48, 7 }
  0xa3   :  { %v222_v51 = vsel %vm220_vm7, %v217_v46, %v218_v49  ;;  %v209_v23 = vsel %vm207_vm8, %v204_v55, %v205_v14  ;;  %v4723_v46 = vld [vmem:[#allocation2 + $0x168] sm:$0xff]  ;;  %v4720_v55 = vld [vmem:[#allocation2 + $0x150] sm:$0xff] }
  0xa4   :  { %v226_v52 = vmul.f32 %v5137_v16, %v222_v51  ;;  %v214_v27 = vmul.f32 %v5135_v15, %v209_v23  ;;  %794 = vmatpush.bf16.msrb.mxu2 %v4723_v46  ;;  %v4710_v51 = vld [vmem:[#allocation2 + $0x100] sm:$0xff] }
  0xa6   :  { %v232_v56 = vpack.c.bf16 %v226_v52, %v226_v52  ;;  %v233_v30 = vpack.c.bf16 %v5160_v48, %v214_v27  ;;  %v4707_v52 = vld [vmem:[#allocation2 + $0xe8] sm:$0xff] }
  0xa8   :  { %v5171_v59 = vpop.f32.mrf.mxu0  ;;  %v302_v61 = vunpack.c.l.b16 %v232_v56  ;;  %v303_v33 = vunpack.c.l.b16 %v233_v30  ;;  %v304_v34 = vunpack.c.h.b16 %v233_v30  ;;  %795 = vmatpush.bf16.msrb.mxu2 %v4722_v50  ;;  %v4705_v56 = vld [vmem:[#allocation2 + $0xd8] sm:$0xff] }
  0xa9   :  { %v206_v62 = vrot.slane %v5171_v59, 7  ;;  %v219_v63 = vrot.slane %v5171_v59, 1 }
  0xaa   :  { %v5177_v2 = vpack.c.b16 %v302_v61, %v299_v60  ;;  %v4704_v60 = vld [vmem:[#allocation2 + $0xd0] sm:$0xff]  ;;  %v4718_v61 = vld [vmem:[#allocation2 + $0x140] sm:$0xff] }
  0xab   :  { %v211_v3 = vsel %vm207_vm8, %v206_v62, %v203_v58  ;;  %v224_v4 = vsel %vm220_vm7, %v219_v63, %v216_v47  ;;  %v221_v18 = vsel %vm220_vm7, %v218_v49, %v219_v63  ;;  %v208_v25 = vsel %vm207_vm8, %v205_v14, %v206_v62  ;;  %v4711_v47 = vld [vmem:[#allocation2 + $0x108] sm:$0xff]  ;;  %v4708_v49 = vld [vmem:[#allocation2 + $0xf0] sm:$0xff] }
  0xac   :  { %511 = vmatmul.bf16.vlgmr.msra.gmra.mxu3 %v5177_v2  ;;  %v212_v5 = vmul.f32 %v5132_v13, %v211_v3  ;;  %v228_v8 = vmul.f32 %v5139_v17, %v224_v4  ;;  %v234_v22 = vpack.c.bf16 %v221_v18, %v221_v18  ;;  %v235_v29 = vpack.c.bf16 %v5171_v59, %v208_v25  ;;  %v4703_v63 = vld [vmem:[#allocation2 + $0xc8] sm:$0xff]  ;;  %v4702_v4 = vld [vmem:[#allocation2 + $0xc0] sm:$0xff] }
  0xad   :  { %779 = vmatpush.bf16.msrb.mxu1 %v4711_v47  ;;  %755 = vmatpush.bf16.msrb.mxu0 %v4708_v49 }
  0xae   :  { %v229_v7 = vpack.c.bf16 %v5153_v44, %v212_v5  ;;  %v236_v21 = vpack.c.bf16 %v228_v8, %v228_v8  ;;  %v305_v26 = vunpack.c.l.b16 %v234_v22  ;;  %v306_v31 = vunpack.c.l.b16 %v235_v29  ;;  %796 = vmatpush.bf16.msrb.mxu2 %v4721_v53 }
  0xaf   :  { %v307_v32 = vunpack.c.h.b16 %v235_v29 }
  0xb0   :  { %v297_v9 = vunpack.c.l.b16 %v229_v7  ;;  %v298_v11 = vunpack.c.h.b16 %v229_v7  ;;  %v308_v24 = vunpack.c.l.b16 %v236_v21  ;;  %v5207_v35 = vpack.c.b16 %v306_v31, %v303_v33 }
  0xb1   :  { %v5209_v36 = vpack.c.b16 %v307_v32, %v304_v34  ;;  %780 = vmatpush.bf16.msrb.mxu1 %v4710_v51  ;;  %756 = vmatpush.bf16.msrb.mxu0 %v4707_v52 }
  0xb2   :  { %v5191_v19 = vpack.c.b16 %v300_v10, %v297_v9  ;;  %v5193_v20 = vpack.c.b16 %v301_v12, %v298_v11  ;;  %v5202_v28 = vpack.c.b16 %v308_v24, %v305_v26  ;;  %797 = vmatpush.bf16.msrb.mxu2 %v4720_v55 }
  0xb4   :  { %473 = vmatmul.bf16.vlgmr.msra.gmra.mxu1 %v5191_v19  ;;  %492 = vmatmul.bf16.vlgmr.msra.gmra.mxu2 %v5193_v20 }
  0xb5   :  { %757 = vmatpush.bf16.msrb.mxu0 %v4706_v54 }
  0xb6   :  { %798 = vmatpush.bf16.msrb.mxu2 %v4719_v57 }
  0xb9   :  { %758 = vmatpush.bf16.msrb.mxu0 %v4705_v56 }
  0xba   :  { %799 = vmatpush.bf16.msrb.mxu2 %v4718_v61 }
  0xbc   :  { %516 = vmatmul.bf16.gmra.mxu3 %v5202_v28 }
  0xbd   :  { %759 = vmatpush.bf16.msrb.mxu0 %v4704_v60 }
  0xc1   :  { %760 = vmatpush.bf16.msrb.mxu0 %v4703_v63 }
  0xc4   :  { %478 = vmatmul.bf16.gmra.mxu1 %v5207_v35  ;;  %497 = vmatmul.bf16.gmra.mxu2 %v5209_v36 }
  0xc5   :  { %761 = vmatpush.bf16.msrb.mxu0 %v4702_v4 }
 0x12f   :  { %v512_v62 = vpop.f32.mrf.mxu3 }
 0x131   :  { %v474_v58 = vpop.f32.mrf.mxu1 }
 0x132   :  { %v475_v6 = vadd.f32 %v4958_v0, %v474_v58 }
 0x137   :  { %v493_v3 = vpop.f32.mrf.mxu2  ;;  %v514_v8 = vpop.f32.mrf.mxu3 }
 0x138   :  { %v494_v7 = vadd.f32 %v493_v3, %v475_v6 }
 0x139   :  { %v476_v5 = vpop.f32.mrf.mxu1 }
 0x13a   :  { %v477_v9 = vadd.f32 %v4958_v0, %v476_v5  ;;  %v513_v11 = vadd.f32 %v512_v62, %v494_v7  ;;  %v4741_v7 = vld [vmem:[#allocation2 + $0x1f8] sm:$0xff] }
 0x13b   :  { %1062 = vmatpush.bf16.msra.mxu0 %v4741_v7 }
 0x13c   :  { %v522_v21 = vmax.f32 %v513_v11, 0.0  ;;  %v4749_v11 = vld [vmem:[#allocation2 + $0x238] sm:$0xff] }
 0x13d   :  { %1081 = vmatpush.bf16.msra.mxu1 %v4749_v11 }
 0x13e   :  { %v538_v38 = vrot.slane %v522_v21, 1  ;;  %v526_v50 = vrot.slane %v522_v21, 7 }
 0x13f   :  { %v495_v10 = vpop.f32.mrf.mxu2  ;;  %v517_v25 = vpop.f32.mrf.mxu3 }
 0x140   :  { %v496_v12 = vadd.f32 %v495_v10, %v477_v9  ;;  %v4739_v9 = vld [vmem:[#allocation2 + $0x1e8] sm:$0xff]  ;;  %v4738_v10 = vld [vmem:[#allocation2 + $0x1e0] sm:$0xff] }
 0x141   :  { %v479_v14 = vpop.f32.mrf.mxu1 }
 0x142   :  { %v515_v18 = vadd.f32 %v514_v8, %v496_v12  ;;  %v480_v23 = vadd.f32 %v4958_v0, %v479_v14  ;;  %v4740_v8 = vld [vmem:[#allocation2 + $0x1f0] sm:$0xff]  ;;  %v4737_v12 = vld [vmem:[#allocation2 + $0x1d8] sm:$0xff] }
 0x143   :  { %1063 = vmatpush.bf16.msra.mxu0 %v4740_v8  ;;  %v4748_v14 = vld [vmem:[#allocation2 + $0x230] sm:$0xff] }
 0x144   :  { %v523_v22 = vmax.f32 %v515_v18, 0.0  ;;  %1082 = vmatpush.bf16.msra.mxu1 %v4748_v14  ;;  %v4736_v18 = vld [vmem:[#allocation2 + $0x1d0] sm:$0xff] }
 0x146   :  { %v551_v24 = vpack.c.bf16 %v523_v22, %v522_v21  ;;  %v539_v32 = vrot.slane %v523_v22, 1  ;;  %v527_v51 = vrot.slane %v523_v22, 7  ;;  %v4733_v21 = vld [vmem:[#allocation2 + $0x1b8] sm:$0xff]  ;;  %v4747_v22 = vld [vmem:[#allocation2 + $0x228] sm:$0xff] }
 0x147   :  { %v498_v26 = vpop.f32.mrf.mxu2  ;;  %v519_v41 = vpop.f32.mrf.mxu3  ;;  %1064 = vmatpush.bf16.msra.mxu0 %v4739_v9  ;;  %1043 = vmatpush.bf16.msrb.mxu3 %v4733_v21 }
 0x148   :  { %v499_v27 = vadd.f32 %v498_v26, %v480_v23  ;;  %781 = vmatmul.bf16.vlgmr.msrb.gmra.mxu1 %v551_v24  ;;  %v544_v46 = vsel %vm220_vm7, %v538_v38, %v539_v32  ;;  %v532_v57 = vsel %vm207_vm8, %v526_v50, %v527_v51  ;;  %v4735_v23 = vld [vmem:[#allocation2 + $0x1c8] sm:$0xff]  ;;  %v4732_v24 = vld [vmem:[#allocation2 + $0x1b0] sm:$0xff]  ;;  %v4734_v26 = vld [vmem:[#allocation2 + $0x1c0] sm:$0xff] }
 0x149   :  { %v481_v30 = vpop.f32.mrf.mxu1  ;;  %1083 = vmatpush.bf16.msra.mxu1 %v4747_v22 }
 0x14a   :  { %v518_v29 = vadd.f32 %v517_v25, %v499_v27  ;;  %v482_v34 = vadd.f32 %v4958_v0, %v481_v30  ;;  %v4746_v25 = vld [vmem:[#allocation2 + $0x220] sm:$0xff]  ;;  %v4731_v27 = vld [vmem:[#allocation2 + $0x1a8] sm:$0xff] }
 0x14b   :  { %1065 = vmatpush.bf16.msra.mxu0 %v4738_v10  ;;  %1044 = vmatpush.bf16.msrb.mxu3 %v4732_v24  ;;  %v4730_v30 = vld [vmem:[#allocation2 + $0x1a0] sm:$0xff] }
 0x14c   :  { %v524_v31 = vmax.f32 %v518_v29, 0.0  ;;  %v4745_v29 = vld [vmem:[#allocation2 + $0x218] sm:$0xff] }
 0x14d   :  { %1084 = vmatpush.bf16.msra.mxu1 %v4746_v25 }
 0x14e   :  { %v540_v33 = vrot.slane %v524_v31, 1  ;;  %v528_v63 = vrot.slane %v524_v31, 7 }
 0x14f   :  { %v500_v37 = vpop.f32.mrf.mxu2  ;;  %1066 = vmatpush.bf16.msra.mxu0 %v4737_v12  ;;  %1045 = vmatpush.bf16.msrb.mxu3 %v4731_v27 }
 0x150   :  { %v501_v39 = vadd.f32 %v500_v37, %v482_v34  ;;  %v543_v40 = vsel %vm220_vm7, %v539_v32, %v540_v33  ;;  %v531_v3 = vsel %vm207_vm8, %v527_v51, %v528_v63  ;;  %v4729_v32 = vld [vmem:[#allocation2 + $0x198] sm:$0xff]  ;;  %v4728_v37 = vld [vmem:[#allocation2 + $0x190] sm:$0xff] }
 0x151   :  { %v547_v42 = vmul.f32 %v5137_v16, %v543_v40  ;;  %v536_v5 = vmul.f32 %v5135_v15, %v531_v3  ;;  %1085 = vmatpush.bf16.msra.mxu1 %v4745_v29  ;;  %v4959_v40 = vld [vmem:[%s5580_s2 + $0x1] ss:$0 sm:$0xff] }
 0x152   :  { %v520_v43 = vadd.f32 %v519_v41, %v501_v39 }
 0x153   :  { %v552_v47 = vpack.c.bf16 %v547_v42, %v544_v46  ;;  %1067 = vmatpush.bf16.msra.mxu0 %v4736_v18  ;;  %1046 = vmatpush.bf16.msrb.mxu3 %v4730_v30  ;;  %v4727_v42 = vld [vmem:[#allocation2 + $0x188] sm:$0xff]  ;;  %v4726_v46 = vld [vmem:[#allocation2 + $0x180] sm:$0xff] }
 0x154   :  { %v525_v49 = vmax.f32 %v520_v43, 0.0 }
 0x155   :  { %800 = vmatmul.bf16.vlgmr.msrb.gmra.mxu2 %v552_v47 }
 0x156   :  { %v529_v52 = vrot.slane %v525_v49, 7  ;;  %v554_v53 = vpack.c.bf16 %v525_v49, %v524_v31  ;;  %v541_v55 = vrot.slane %v525_v49, 1  ;;  %v4744_v31 = vld [vmem:[#allocation2 + $0x210] sm:$0xff] }
 0x157   :  { %1068 = vmatpush.bf16.msra.mxu0 %v4735_v23  ;;  %1086 = vmatpush.bf16.msra.mxu1 %v4744_v31 }
 0x158   :  { %786 = vmatmul.bf16.gmra.mxu1 %v554_v53  ;;  %v533_v54 = vsel %vm207_vm8, %v529_v52, %v526_v50  ;;  %v545_v60 = vsel %vm220_vm7, %v541_v55, %v538_v38  ;;  %v542_v62 = vsel %vm220_vm7, %v540_v33, %v541_v55  ;;  %v530_v4 = vsel %vm207_vm8, %v528_v63, %v529_v52  ;;  %v4743_v33 = vld [vmem:[#allocation2 + $0x208] sm:$0xff]  ;;  %v4742_v38 = vld [vmem:[#allocation2 + $0x200] sm:$0xff] }
 0x159   :  { %v534_v56 = vmul.f32 %v5132_v13, %v533_v54  ;;  %v549_v61 = vmul.f32 %v5139_v17, %v545_v60  ;;  %v553_v6 = vpack.c.bf16 %v530_v4, %v536_v5  ;;  %1047 = vmatpush.bf16.msrb.mxu3 %v4729_v32 }
 0x15b   :  { %v550_v58 = vpack.c.bf16 %v532_v57, %v534_v56  ;;  %v555_v0 = vpack.c.bf16 %v549_v61, %v542_v62  ;;  %1069 = vmatpush.bf16.msra.mxu0 %v4734_v26  ;;  %1087 = vmatpush.bf16.msra.mxu1 %v4743_v33 }
 0x15d   :  { %762 = vmatmul.bf16.vlgmr.msrb.gmra.mxu0 %v550_v58  ;;  %1048 = vmatpush.bf16.msrb.mxu3 %v4728_v37 }
 0x15f   :  { %1088 = vmatpush.bf16.msra.mxu1 %v4742_v38 }
 0x161   :  { %1049 = vmatpush.bf16.msrb.mxu3 %v4727_v42  ;;  %v4765_v42 = vld [vmem:[#allocation2 + $0x2b8] sm:$0xff] }
 0x165   :  { %805 = vmatmul.bf16.gmra.mxu2 %v555_v0  ;;  %1050 = vmatpush.bf16.msrb.mxu3 %v4726_v46  ;;  %v4763_v46 = vld [vmem:[#allocation2 + $0x2a8] sm:$0xff] }
 0x169   :  { %1351 = vmatpush.bf16.msra.mxu3 %v4765_v42 }
 0x16d   :  { %767 = vmatmul.bf16.gmra.mxu0 %v553_v6 }
 0x1c5   :  { %v782_v34 = vpop.f32.mrf.mxu1 }
 0x1cd   :  { %v784_v47 = vpop.f32.mrf.mxu1 }
 0x1d5   :  { %v787_v58 = vpop.f32.mrf.mxu1 }
 0x1d8   :  { %v801_v39 = vpop.f32.mrf.mxu2 }
 0x1da   :  { %v763_v41 = vpop.f32.mrf.mxu0 }
 0x1db   :  { %v764_v43 = vadd.f32 %v4959_v40, %v763_v41 }
 0x1dd   :  { %v783_v49 = vadd.f32 %v782_v34, %v764_v43  ;;  %v789_v7 = vpop.f32.mrf.mxu1  ;;  %v4764_v43 = vld [vmem:[#allocation2 + $0x2b0] sm:$0xff] }
 0x1de   :  { %1352 = vmatpush.bf16.msra.mxu3 %v4764_v43 }
 0x1df   :  { %v802_v53 = vadd.f32 %v801_v39, %v783_v49  ;;  %v4773_v49 = vld [vmem:[#allocation2 + $0x2f8] sm:$0xff] }
 0x1e0   :  { %v803_v50 = vpop.f32.mrf.mxu2  ;;  %1370 = vmatpush.bf16.msrb.mxu0 %v4773_v49 }
 0x1e1   :  { %v5240_v56 = vadd.f32 %v802_v53, %v5153_v44  ;;  %v4757_v53 = vld [vmem:[#allocation2 + $0x278] sm:$0xff] }
 0x1e2   :  { %v765_v51 = vpop.f32.mrf.mxu0  ;;  %1353 = vmatpush.bf16.msra.mxu3 %v4763_v46  ;;  %1332 = vmatpush.bf16.msra.mxu2 %v4757_v53 }
 0x1e3   :  { %v766_v52 = vadd.f32 %v4959_v40, %v765_v51  ;;  %v827_v9 = vrot.slane %v5240_v56, 1  ;;  %v815_v23 = vrot.slane %v5240_v56, 7  ;;  %v4772_v51 = vld [vmem:[#allocation2 + $0x2f0] sm:$0xff] }
 0x1e4   :  { %1371 = vmatpush.bf16.msrb.mxu0 %v4772_v51 }
 0x1e5   :  { %v785_v54 = vadd.f32 %v784_v47, %v766_v52  ;;  %v4762_v47 = vld [vmem:[#allocation2 + $0x2a0] sm:$0xff]  ;;  %v4760_v52 = vld [vmem:[#allocation2 + $0x290] sm:$0xff] }
 0x1e6   :  { %1354 = vmatpush.bf16.msra.mxu3 %v4762_v47 }
 0x1e7   :  { %v804_v55 = vadd.f32 %v803_v50, %v785_v54  ;;  %v4761_v50 = vld [vmem:[#allocation2 + $0x298] sm:$0xff]  ;;  %v4771_v54 = vld [vmem:[#allocation2 + $0x2e8] sm:$0xff] }
 0x1e8   :  { %v806_v63 = vpop.f32.mrf.mxu2  ;;  %1372 = vmatpush.bf16.msrb.mxu0 %v4771_v54 }
 0x1e9   :  { %v5243_v57 = vadd.f32 %v804_v55, %v5155_v45  ;;  %v4759_v55 = vld [vmem:[#allocation2 + $0x288] sm:$0xff] }
 0x1ea   :  { %v768_v60 = vpop.f32.mrf.mxu0  ;;  %1355 = vmatpush.bf16.msra.mxu3 %v4761_v50 }
 0x1eb   :  { %v769_v61 = vadd.f32 %v4959_v40, %v768_v60  ;;  %v840_v62 = vpack.c.bf16 %v5243_v57, %v5240_v56  ;;  %v828_v45 = vrot.slane %v5243_v57, 1  ;;  %v816_v24 = vrot.slane %v5243_v57, 7  ;;  %v4770_v60 = vld [vmem:[#allocation2 + $0x2e0] sm:$0xff] }
 0x1ec   :  { %1373 = vmatpush.bf16.msrb.mxu0 %v4770_v60 }
 0x1ed   :  { %v788_v0 = vadd.f32 %v787_v58, %v769_v61  ;;  %1070 = vmatmul.bf16.vlgmr.msra.gmra.mxu0 %v840_v62  ;;  %v4756_v58 = vld [vmem:[#allocation2 + $0x270] sm:$0xff]  ;;  %v4758_v61 = vld [vmem:[#allocation2 + $0x280] sm:$0xff]  ;;  %v4755_v62 = vld [vmem:[#allocation2 + $0x268] sm:$0xff] }
 0x1ee   :  { %1356 = vmatpush.bf16.msra.mxu3 %v4760_v52  ;;  %1333 = vmatpush.bf16.msra.mxu2 %v4756_v58 }
 0x1ef   :  { %v807_v3 = vadd.f32 %v806_v63, %v788_v0  ;;  %v4769_v63 = vld [vmem:[#allocation2 + $0x2d8] sm:$0xff]  ;;  %v4754_v0 = vld [vmem:[#allocation2 + $0x260] sm:$0xff] }
 0x1f0   :  { %v808_v11 = vpop.f32.mrf.mxu2  ;;  %1374 = vmatpush.bf16.msrb.mxu0 %v4769_v63 }
 0x1f1   :  { %v5248_v4 = vadd.f32 %v807_v3, %v5160_v48  ;;  %v833_v48 = vsel %vm220_vm7, %v827_v9, %v828_v45  ;;  %v4768_v3 = vld [vmem:[#allocation2 + $0x2d0] sm:$0xff] }
 0x1f2   :  { %v770_v5 = vpop.f32.mrf.mxu0  ;;  %1357 = vmatpush.bf16.msra.mxu3 %v4759_v55  ;;  %1334 = vmatpush.bf16.msra.mxu2 %v4755_v62 }
 0x1f3   :  { %v829_v44 = vrot.slane %v5248_v4, 1  ;;  %v771_v6 = vadd.f32 %v4959_v40, %v770_v5  ;;  %v817_v34 = vrot.slane %v5248_v4, 7  ;;  %v4753_v5 = vld [vmem:[#allocation2 + $0x258] sm:$0xff] }
 0x1f4   :  { %1375 = vmatpush.bf16.msrb.mxu0 %v4768_v3 }
 0x1f5   :  { %v790_v8 = vadd.f32 %v789_v7, %v771_v6  ;;  %v832_v10 = vsel %vm220_vm7, %v828_v45, %v829_v44  ;;  %v820_v38 = vsel %vm207_vm8, %v816_v24, %v817_v34  ;;  %v4752_v45 = vld [vmem:[#allocation2 + $0x250] sm:$0xff]  ;;  %v4766_v7 = vld [vmem:[#allocation2 + $0x2c0] sm:$0xff] }
 0x1f6   :  { %v836_v12 = vmul.f32 %v5137_v16, %v832_v10  ;;  %v825_v40 = vmul.f32 %v5135_v15, %v820_v38  ;;  %1358 = vmatpush.bf16.msra.mxu3 %v4758_v61  ;;  %1335 = vmatpush.bf16.msra.mxu2 %v4754_v0 }
 0x1f7   :  { %v809_v14 = vadd.f32 %v808_v11, %v790_v8  ;;  %v4751_v11 = vld [vmem:[#allocation2 + $0x248] sm:$0xff] }
 0x1f8   :  { %v841_v18 = vpack.c.bf16 %v836_v12, %v833_v48 }
 0x1f9   :  { %v5259_v21 = vadd.f32 %v809_v14, %v5171_v59  ;;  %v821_v59 = vsel %vm207_vm8, %v815_v23, %v816_v24  ;;  %v4750_v14 = vld [vmem:[#allocation2 + $0x240] sm:$0xff] }
 0x1fa   :  { %1089 = vmatmul.bf16.vlgmr.msra.gmra.mxu1 %v841_v18  ;;  %1336 = vmatpush.bf16.msra.mxu2 %v4753_v5 }
 0x1fb   :  { %v843_v22 = vpack.c.bf16 %v5259_v21, %v5248_v4  ;;  %v818_v25 = vrot.slane %v5259_v21, 7  ;;  %v830_v27 = vrot.slane %v5259_v21, 1 }
 0x1fd   :  { %1075 = vmatmul.bf16.gmra.mxu0 %v843_v22  ;;  %v822_v26 = vsel %vm207_vm8, %v818_v25, %v815_v23  ;;  %v834_v31 = vsel %vm220_vm7, %v830_v27, %v827_v9  ;;  %v831_v33 = vsel %vm220_vm7, %v829_v44, %v830_v27  ;;  %v819_v39 = vsel %vm207_vm8, %v817_v34, %v818_v25  ;;  %v4767_v44 = vld [vmem:[#allocation2 + $0x2c8] sm:$0xff]  ;;  %v4960_v9 = vld [vmem:[%s5580_s2 + $0x2] ss:$0 sm:$0xff] }
 0x1fe   :  { %v823_v29 = vmul.f32 %v5132_v13, %v822_v26  ;;  %v838_v32 = vmul.f32 %v5139_v17, %v834_v31  ;;  %v842_v41 = vpack.c.bf16 %v819_v39, %v825_v40  ;;  %1376 = vmatpush.bf16.msrb.mxu0 %v4767_v44  ;;  %1337 = vmatpush.bf16.msra.mxu2 %v4752_v45 }
 0x200   :  { %v839_v30 = vpack.c.bf16 %v821_v59, %v823_v29  ;;  %v844_v37 = vpack.c.bf16 %v838_v32, %v831_v33 }
 0x202   :  { %1051 = vmatmul.bf16.vlgmr.msrb.gmra.mxu3 %v839_v30  ;;  %1377 = vmatpush.bf16.msrb.mxu0 %v4766_v7 }
 0x203   :  { %1338 = vmatpush.bf16.msra.mxu2 %v4751_v11 }
 0x207   :  { %1339 = vmatpush.bf16.msra.mxu2 %v4750_v14 }
 0x20a   :  { %1094 = vmatmul.bf16.gmra.mxu1 %v844_v37 }
 0x212   :  { %1056 = vmatmul.bf16.gmra.mxu3 %v842_v41 }
 0x26a   :  { %v1071_v6 = vpop.f32.mrf.mxu0 }
 0x272   :  { %v1073_v48 = vpop.f32.mrf.mxu0 }
 0x277   :  { %v1090_v8 = vpop.f32.mrf.mxu1 }
 0x27a   :  { %v1076_v30 = vpop.f32.mrf.mxu0 }
 0x27f   :  { %v1092_v22 = vpop.f32.mrf.mxu1 }
 0x282   :  { %v1078_v46 = vpop.f32.mrf.mxu0 }
 0x285   :  { %v1052_v10 = vpop.f32.mrf.mxu3 }
 0x286   :  { %v1053_v12 = vadd.f32 %v4960_v9, %v1052_v10 }
 0x287   :  { %v1095_v34 = vpop.f32.mrf.mxu1 }
 0x288   :  { %v1072_v18 = vadd.f32 %v1071_v6, %v1053_v12 }
 0x28a   :  { %v1091_v25 = vadd.f32 %v1090_v8, %v1072_v18  ;;  %v4789_v18 = vld [vmem:[#allocation2 + $0x378] sm:$0xff] }
 0x28b   :  { %1640 = vmatpush.bf16.msrb.mxu2 %v4789_v18 }
 0x28c   :  { %v1100_v29 = vmax.f32 %v1091_v25, 0.0  ;;  %v4797_v25 = vld [vmem:[#allocation2 + $0x3b8] sm:$0xff] }
 0x28d   :  { %v1054_v23 = vpop.f32.mrf.mxu3  ;;  %1659 = vmatpush.bf16.msrb.mxu3 %v4797_v25 }
 0x28e   :  { %v1055_v24 = vadd.f32 %v4960_v9, %v1054_v23  ;;  %v1116_v47 = vrot.slane %v1100_v29, 1  ;;  %v1104_v60 = vrot.slane %v1100_v29, 7  ;;  %v4787_v23 = vld [vmem:[#allocation2 + $0x368] sm:$0xff] }
 0x28f   :  { %v1097_v51 = vpop.f32.mrf.mxu1 }
 0x290   :  { %v1074_v26 = vadd.f32 %v1073_v48, %v1055_v24  ;;  %v4786_v24 = vld [vmem:[#allocation2 + $0x360] sm:$0xff] }
 0x292   :  { %v1093_v27 = vadd.f32 %v1092_v22, %v1074_v26  ;;  %v4788_v22 = vld [vmem:[#allocation2 + $0x370] sm:$0xff]  ;;  %v4785_v26 = vld [vmem:[#allocation2 + $0x358] sm:$0xff] }
 0x293   :  { %1641 = vmatpush.bf16.msrb.mxu2 %v4788_v22 }
 0x294   :  { %v1101_v59 = vmax.f32 %v1093_v27, 0.0  ;;  %v4796_v27 = vld [vmem:[#allocation2 + $0x3b0] sm:$0xff] }
 0x295   :  { %v1057_v31 = vpop.f32.mrf.mxu3  ;;  %1660 = vmatpush.bf16.msrb.mxu3 %v4796_v27 }
 0x296   :  { %v1058_v32 = vadd.f32 %v4960_v9, %v1057_v31  ;;  %v1129_v33 = vpack.c.bf16 %v1101_v59, %v1100_v29  ;;  %v1117_v41 = vrot.slane %v1101_v59, 1  ;;  %v1105_v61 = vrot.slane %v1101_v59, 7  ;;  %v4784_v29 = vld [vmem:[#allocation2 + $0x350] sm:$0xff]  ;;  %v4781_v59 = vld [vmem:[#allocation2 + $0x338] sm:$0xff]  ;;  %v4783_v31 = vld [vmem:[#allocation2 + $0x348] sm:$0xff] }
 0x297   :  { %1642 = vmatpush.bf16.msrb.mxu2 %v4787_v23  ;;  %1621 = vmatpush.bf16.msrb.mxu1 %v4781_v59 }
 0x298   :  { %v1077_v37 = vadd.f32 %v1076_v30, %v1058_v32  ;;  %1359 = vmatmul.bf16.vlgmr.msra.gmra.mxu3 %v1129_v33  ;;  %v1122_v54 = vsel %vm220_vm7, %v1116_v47, %v1117_v41  ;;  %v1110_v44 = vsel %vm207_vm8, %v1104_v60, %v1105_v61  ;;  %v4795_v30 = vld [vmem:[#allocation2 + $0x3a8] sm:$0xff]  ;;  %v4780_v32 = vld [vmem:[#allocation2 + $0x330] sm:$0xff]  ;;  %v4794_v33 = vld [vmem:[#allocation2 + $0x3a0] sm:$0xff] }
 0x299   :  { %1661 = vmatpush.bf16.msrb.mxu3 %v4795_v30 }
 0x29a   :  { %v1096_v38 = vadd.f32 %v1095_v34, %v1077_v37  ;;  %v4782_v34 = vld [vmem:[#allocation2 + $0x340] sm:$0xff]  ;;  %v4779_v37 = vld [vmem:[#allocation2 + $0x328] sm:$0xff] }
 0x29b   :  { %1643 = vmatpush.bf16.msrb.mxu2 %v4786_v24  ;;  %1622 = vmatpush.bf16.msrb.mxu1 %v4780_v32 }
 0x29c   :  { %v1102_v39 = vmax.f32 %v1096_v38, 0.0  ;;  %v4793_v38 = vld [vmem:[#allocation2 + $0x398] sm:$0xff] }
 0x29d   :  { %v1059_v40 = vpop.f32.mrf.mxu3  ;;  %1662 = vmatpush.bf16.msrb.mxu3 %v4794_v33 }
 0x29e   :  { %v1118_v42 = vrot.slane %v1102_v39, 1  ;;  %v1060_v43 = vadd.f32 %v4960_v9, %v1059_v40  ;;  %v1106_v9 = vrot.slane %v1102_v39, 7  ;;  %v4792_v40 = vld [vmem:[#allocation2 + $0x390] sm:$0xff] }
 0x29f   :  { %1644 = vmatpush.bf16.msrb.mxu2 %v4785_v26  ;;  %1623 = vmatpush.bf16.msrb.mxu1 %v4779_v37 }
 0x2a0   :  { %v1079_v49 = vadd.f32 %v1078_v46, %v1060_v43  ;;  %v1121_v50 = vsel %vm220_vm7, %v1117_v41, %v1118_v42  ;;  %v1109_v11 = vsel %vm207_vm8, %v1105_v61, %v1106_v9  ;;  %v4777_v41 = vld [vmem:[#allocation2 + $0x318] sm:$0xff]  ;;  %v4776_v46 = vld [vmem:[#allocation2 + $0x310] sm:$0xff] }
 0x2a1   :  { %v1125_v52 = vmul.f32 %v5137_v16, %v1121_v50  ;;  %v1114_v14 = vmul.f32 %v5135_v15, %v1109_v11  ;;  %1663 = vmatpush.bf16.msrb.mxu3 %v4793_v38  ;;  %v4961_v50 = vld [vmem:[%s5580_s2 + $0x3] ss:$0 sm:$0xff] }
 0x2a2   :  { %v1098_v53 = vadd.f32 %v1097_v51, %v1079_v49 }
 0x2a3   :  { %v1130_v55 = vpack.c.bf16 %v1125_v52, %v1122_v54  ;;  %1645 = vmatpush.bf16.msrb.mxu2 %v4784_v29  ;;  %v4775_v52 = vld [vmem:[#allocation2 + $0x308] sm:$0xff]  ;;  %v4774_v54 = vld [vmem:[#allocation2 + $0x300] sm:$0xff] }
 0x2a4   :  { %v1103_v58 = vmax.f32 %v1098_v53, 0.0 }
 0x2a5   :  { %1378 = vmatmul.bf16.vlgmr.msrb.gmra.mxu0 %v1130_v55  ;;  %1664 = vmatpush.bf16.msrb.mxu3 %v4792_v40 }
 0x2a6   :  { %v1107_v62 = vrot.slane %v1103_v58, 7  ;;  %v1132_v63 = vpack.c.bf16 %v1103_v58, %v1102_v39  ;;  %v1119_v3 = vrot.slane %v1103_v58, 1  ;;  %v4778_v39 = vld [vmem:[#allocation2 + $0x320] sm:$0xff] }
 0x2a7   :  { %1646 = vmatpush.bf16.msrb.mxu2 %v4783_v31  ;;  %1624 = vmatpush.bf16.msrb.mxu1 %v4778_v39 }
 0x2a8   :  { %1364 = vmatmul.bf16.gmra.mxu3 %v1132_v63  ;;  %v1111_v0 = vsel %vm207_vm8, %v1107_v62, %v1104_v60  ;;  %v1123_v45 = vsel %vm220_vm7, %v1119_v3, %v1116_v47  ;;  %v1120_v8 = vsel %vm220_vm7, %v1118_v42, %v1119_v3  ;;  %v1108_v12 = vsel %vm207_vm8, %v1106_v9, %v1107_v62  ;;  %v4791_v42 = vld [vmem:[#allocation2 + $0x388] sm:$0xff]  ;;  %v4790_v47 = vld [vmem:[#allocation2 + $0x380] sm:$0xff] }
 0x2a9   :  { %v1112_v5 = vmul.f32 %v5132_v13, %v1111_v0  ;;  %v1127_v7 = vmul.f32 %v5139_v17, %v1123_v45  ;;  %v1131_v48 = vpack.c.bf16 %v1108_v12, %v1114_v14  ;;  %1665 = vmatpush.bf16.msrb.mxu3 %v4791_v42 }
 0x2ab   :  { %v1128_v6 = vpack.c.bf16 %v1110_v44, %v1112_v5  ;;  %v1133_v10 = vpack.c.bf16 %v1127_v7, %v1120_v8  ;;  %1647 = vmatpush.bf16.msrb.mxu2 %v4782_v34  ;;  %1625 = vmatpush.bf16.msrb.mxu1 %v4777_v41 }
 0x2ad   :  { %1340 = vmatmul.bf16.vlgmr.msra.gmra.mxu2 %v1128_v6  ;;  %1666 = vmatpush.bf16.msrb.mxu3 %v4790_v47 }
 0x2af   :  { %1626 = vmatpush.bf16.msrb.mxu1 %v4776_v46 }
 0x2b3   :  { %1627 = vmatpush.bf16.msrb.mxu1 %v4775_v52  ;;  %v4813_v52 = vld [vmem:[#allocation2 + $0x438] sm:$0xff] }
 0x2b5   :  { %1383 = vmatmul.bf16.gmra.mxu0 %v1133_v10 }
 0x2b7   :  { %1628 = vmatpush.bf16.msrb.mxu1 %v4774_v54  ;;  %v4811_v54 = vld [vmem:[#allocation2 + $0x428] sm:$0xff] }
 0x2bb   :  { %1929 = vmatpush.bf16.msra.mxu1 %v4813_v52 }
 0x2bd   :  { %1345 = vmatmul.bf16.gmra.mxu2 %v1131_v48 }
 0x31b   :  { %v1360_v43 = vpop.f32.mrf.mxu3 }
 0x322   :  { %v1379_v49 = vpop.f32.mrf.mxu0 }
 0x323   :  { %v1362_v55 = vpop.f32.mrf.mxu3 }
 0x32a   :  { %v1381_v60 = vpop.f32.mrf.mxu0 }
 0x32b   :  { %v1365_v6 = vpop.f32.mrf.mxu3 }
 0x330   :  { %v1341_v51 = vpop.f32.mrf.mxu2 }
 0x331   :  { %v1342_v53 = vadd.f32 %v4961_v50, %v1341_v51 }
 0x332   :  { %v1384_v9 = vpop.f32.mrf.mxu0 }
 0x333   :  { %v1361_v58 = vadd.f32 %v1360_v43, %v1342_v53  ;;  %v1367_v18 = vpop.f32.mrf.mxu3  ;;  %v4812_v53 = vld [vmem:[#allocation2 + $0x430] sm:$0xff] }
 0x334   :  { %1930 = vmatpush.bf16.msra.mxu1 %v4812_v53 }
 0x335   :  { %v1380_v63 = vadd.f32 %v1379_v49, %v1361_v58  ;;  %v4821_v58 = vld [vmem:[#allocation2 + $0x478] sm:$0xff] }
 0x336   :  { %1948 = vmatpush.bf16.msra.mxu2 %v4821_v58 }
 0x337   :  { %v5310_v5 = vadd.f32 %v1380_v63, %v5240_v56  ;;  %v4805_v63 = vld [vmem:[#allocation2 + $0x3f8] sm:$0xff] }
 0x338   :  { %v1343_v61 = vpop.f32.mrf.mxu2  ;;  %1931 = vmatpush.bf16.msra.mxu1 %v4811_v54  ;;  %1910 = vmatpush.bf16.msra.mxu0 %v4805_v63 }
 0x339   :  { %v1344_v62 = vadd.f32 %v4961_v50, %v1343_v61  ;;  %v1405_v23 = vrot.slane %v5310_v5, 1  ;;  %v1393_v31 = vrot.slane %v5310_v5, 7  ;;  %v4820_v61 = vld [vmem:[#allocation2 + $0x470] sm:$0xff] }
 0x33a   :  { %v1386_v25 = vpop.f32.mrf.mxu0  ;;  %1949 = vmatpush.bf16.msra.mxu2 %v4820_v61 }
 0x33b   :  { %v1363_v0 = vadd.f32 %v1362_v55, %v1344_v62  ;;  %v4810_v55 = vld [vmem:[#allocation2 + $0x420] sm:$0xff]  ;;  %v4808_v62 = vld [vmem:[#allocation2 + $0x410] sm:$0xff] }
 0x33c   :  { %1932 = vmatpush.bf16.msra.mxu1 %v4810_v55 }
 0x33d   :  { %v1382_v3 = vadd.f32 %v1381_v60, %v1363_v0  ;;  %v4809_v60 = vld [vmem:[#allocation2 + $0x418] sm:$0xff]  ;;  %v4819_v0 = vld [vmem:[#allocation2 + $0x468] sm:$0xff] }
 0x33e   :  { %1950 = vmatpush.bf16.msra.mxu2 %v4819_v0 }
 0x33f   :  { %v5313_v44 = vadd.f32 %v1382_v3, %v5243_v57  ;;  %v4807_v3 = vld [vmem:[#allocation2 + $0x408] sm:$0xff] }
 0x340   :  { %v1346_v45 = vpop.f32.mrf.mxu2  ;;  %1933 = vmatpush.bf16.msra.mxu1 %v4809_v60 }
 0x341   :  { %v1347_v7 = vadd.f32 %v4961_v50, %v1346_v45  ;;  %v1418_v8 = vpack.c.bf16 %v5313_v44, %v5310_v5  ;;  %v1406_v57 = vrot.slane %v5313_v44, 1  ;;  %v1394_v32 = vrot.slane %v5313_v44, 7  ;;  %v4818_v45 = vld [vmem:[#allocation2 + $0x460] sm:$0xff] }
 0x342   :  { %1951 = vmatpush.bf16.msra.mxu2 %v4818_v45 }
 0x343   :  { %v1366_v10 = vadd.f32 %v1365_v6, %v1347_v7  ;;  %1648 = vmatmul.bf16.vlgmr.msrb.gmra.mxu2 %v1418_v8  ;;  %v4804_v6 = vld [vmem:[#allocation2 + $0x3f0] sm:$0xff]  ;;  %v4806_v7 = vld [vmem:[#allocation2 + $0x400] sm:$0xff]  ;;  %v4803_v8 = vld [vmem:[#allocation2 + $0x3e8] sm:$0xff] }
 0x344   :  { %1934 = vmatpush.bf16.msra.mxu1 %v4808_v62  ;;  %1911 = vmatpush.bf16.msra.mxu0 %v4804_v6 }
 0x345   :  { %v1385_v11 = vadd.f32 %v1384_v9, %v1366_v10  ;;  %v4817_v9 = vld [vmem:[#allocation2 + $0x458] sm:$0xff]  ;;  %v4802_v10 = vld [vmem:[#allocation2 + $0x3e0] sm:$0xff] }
 0x346   :  { %1952 = vmatpush.bf16.msra.mxu2 %v4817_v9 }
 0x347   :  { %v5318_v12 = vadd.f32 %v1385_v11, %v5248_v4  ;;  %v1411_v4 = vsel %vm220_vm7, %v1405_v23, %v1406_v57  ;;  %v4816_v11 = vld [vmem:[#allocation2 + $0x450] sm:$0xff] }
 0x348   :  { %v1348_v14 = vpop.f32.mrf.mxu2  ;;  %1935 = vmatpush.bf16.msra.mxu1 %v4807_v3  ;;  %1912 = vmatpush.bf16.msra.mxu0 %v4803_v8 }
 0x349   :  { %v1407_v56 = vrot.slane %v5318_v12, 1  ;;  %v1349_v48 = vadd.f32 %v4961_v50, %v1348_v14  ;;  %v1395_v43 = vrot.slane %v5318_v12, 7  ;;  %v4801_v14 = vld [vmem:[#allocation2 + $0x3d8] sm:$0xff] }
 0x34a   :  { %1953 = vmatpush.bf16.msra.mxu2 %v4816_v11 }
 0x34b   :  { %v1368_v22 = vadd.f32 %v1367_v18, %v1349_v48  ;;  %v1410_v24 = vsel %vm220_vm7, %v1406_v57, %v1407_v56  ;;  %v1398_v47 = vsel %vm207_vm8, %v1394_v32, %v1395_v43  ;;  %v4800_v57 = vld [vmem:[#allocation2 + $0x3d0] sm:$0xff]  ;;  %v4814_v18 = vld [vmem:[#allocation2 + $0x440] sm:$0xff] }
 0x34c   :  { %v1414_v26 = vmul.f32 %v5137_v16, %v1410_v24  ;;  %v1403_v50 = vmul.f32 %v5135_v15, %v1398_v47  ;;  %1936 = vmatpush.bf16.msra.mxu1 %v4806_v7  ;;  %1913 = vmatpush.bf16.msra.mxu0 %v4802_v10 }
 0x34d   :  { %v1387_v27 = vadd.f32 %v1386_v25, %v1368_v22  ;;  %v4799_v25 = vld [vmem:[#allocation2 + $0x3c8] sm:$0xff] }
 0x34e   :  { %v1419_v29 = vpack.c.bf16 %v1414_v26, %v1411_v4 }
 0x34f   :  { %v5329_v59 = vadd.f32 %v1387_v27, %v5259_v21  ;;  %v1399_v21 = vsel %vm207_vm8, %v1393_v31, %v1394_v32  ;;  %v4798_v27 = vld [vmem:[#allocation2 + $0x3c0] sm:$0xff] }
 0x350   :  { %1667 = vmatmul.bf16.vlgmr.msrb.gmra.mxu3 %v1419_v29  ;;  %1914 = vmatpush.bf16.msra.mxu0 %v4801_v14 }
 0x351   :  { %v1421_v30 = vpack.c.bf16 %v5329_v59, %v5318_v12  ;;  %v1396_v33 = vrot.slane %v5329_v59, 7  ;;  %v1408_v37 = vrot.slane %v5329_v59, 1 }
 0x353   :  { %1653 = vmatmul.bf16.gmra.mxu2 %v1421_v30  ;;  %v1400_v34 = vsel %vm207_vm8, %v1396_v33, %v1393_v31  ;;  %v1412_v40 = vsel %vm220_vm7, %v1408_v37, %v1405_v23  ;;  %v1409_v42 = vsel %vm220_vm7, %v1407_v56, %v1408_v37  ;;  %v1397_v49 = vsel %vm207_vm8, %v1395_v43, %v1396_v33  ;;  %v4815_v56 = vld [vmem:[#allocation2 + $0x448] sm:$0xff]  ;;  %v4962_v23 = vld [vmem:[%s5580_s2 + $0x4] ss:$0 sm:$0xff] }
 0x354   :  { %v1401_v38 = vmul.f32 %v5132_v13, %v1400_v34  ;;  %v1416_v41 = vmul.f32 %v5139_v17, %v1412_v40  ;;  %v1420_v51 = vpack.c.bf16 %v1397_v49, %v1403_v50  ;;  %1954 = vmatpush.bf16.msra.mxu2 %v4815_v56  ;;  %1915 = vmatpush.bf16.msra.mxu0 %v4800_v57 }
 0x356   :  { %v1417_v39 = vpack.c.bf16 %v1399_v21, %v1401_v38  ;;  %v1422_v46 = vpack.c.bf16 %v1416_v41, %v1409_v42 }
 0x358   :  { %1629 = vmatmul.bf16.vlgmr.msrb.gmra.mxu1 %v1417_v39  ;;  %1955 = vmatpush.bf16.msra.mxu2 %v4814_v18 }
 0x359   :  { %1916 = vmatpush.bf16.msra.mxu0 %v4799_v25 }
 0x35d   :  { %1917 = vmatpush.bf16.msra.mxu0 %v4798_v27 }
 0x360   :  { %1672 = vmatmul.bf16.gmra.mxu3 %v1422_v46 }
 0x368   :  { %1634 = vmatmul.bf16.gmra.mxu1 %v1420_v51 }
 0x3c6   :  { %v1649_v48 = vpop.f32.mrf.mxu2 }
 0x3ce   :  { %v1651_v4 = vpop.f32.mrf.mxu2 }
 0x3d3   :  { %v1668_v22 = vpop.f32.mrf.mxu3 }
 0x3d5   :  { %v1630_v24 = vpop.f32.mrf.mxu1 }
 0x3d6   :  { %v1631_v26 = vadd.f32 %v4962_v23, %v1630_v24  ;;  %v1654_v39 = vpop.f32.mrf.mxu2 }
 0x3d8   :  { %v1650_v29 = vadd.f32 %v1649_v48, %v1631_v26 }
 0x3da   :  { %v1669_v33 = vadd.f32 %v1668_v22, %v1650_v29  ;;  %v4837_v29 = vld [vmem:[#allocation2 + $0x4f8] sm:$0xff] }
 0x3db   :  { %v1670_v30 = vpop.f32.mrf.mxu3  ;;  %2218 = vmatpush.bf16.msrb.mxu0 %v4837_v29 }
 0x3dc   :  { %v1678_v38 = vmax.f32 %v1669_v33, 0.0  ;;  %v4845_v33 = vld [vmem:[#allocation2 + $0x538] sm:$0xff] }
 0x3dd   :  { %v1632_v31 = vpop.f32.mrf.mxu1  ;;  %2237 = vmatpush.bf16.msrb.mxu1 %v4845_v33 }
 0x3de   :  { %v1633_v32 = vadd.f32 %v4962_v23, %v1632_v31  ;;  %v1656_v54 = vpop.f32.mrf.mxu2  ;;  %v1694_v55 = vrot.slane %v1678_v38, 1  ;;  %v1682_v45 = vrot.slane %v1678_v38, 7  ;;  %v4835_v31 = vld [vmem:[#allocation2 + $0x4e8] sm:$0xff] }
 0x3e0   :  { %v1652_v34 = vadd.f32 %v1651_v4, %v1633_v32  ;;  %v4834_v32 = vld [vmem:[#allocation2 + $0x4e0] sm:$0xff] }
 0x3e2   :  { %v1671_v37 = vadd.f32 %v1670_v30, %v1652_v34  ;;  %v4836_v30 = vld [vmem:[#allocation2 + $0x4f0] sm:$0xff]  ;;  %v4833_v34 = vld [vmem:[#allocation2 + $0x4d8] sm:$0xff] }
 0x3e3   :  { %v1673_v43 = vpop.f32.mrf.mxu3  ;;  %2219 = vmatpush.bf16.msrb.mxu0 %v4836_v30 }
 0x3e4   :  { %v1679_v21 = vmax.f32 %v1671_v37, 0.0  ;;  %v4844_v37 = vld [vmem:[#allocation2 + $0x530] sm:$0xff] }
 0x3e5   :  { %v1635_v40 = vpop.f32.mrf.mxu1  ;;  %2238 = vmatpush.bf16.msrb.mxu1 %v4844_v37 }
 0x3e6   :  { %v1636_v41 = vadd.f32 %v4962_v23, %v1635_v40  ;;  %v1707_v42 = vpack.c.bf16 %v1679_v21, %v1678_v38  ;;  %v1695_v51 = vrot.slane %v1679_v21, 1  ;;  %v1683_v7 = vrot.slane %v1679_v21, 7  ;;  %v4832_v38 = vld [vmem:[#allocation2 + $0x4d0] sm:$0xff]  ;;  %v4829_v21 = vld [vmem:[#allocation2 + $0x4b8] sm:$0xff]  ;;  %v4831_v40 = vld [vmem:[#allocation2 + $0x4c8] sm:$0xff] }
 0x3e7   :  { %2220 = vmatpush.bf16.msrb.mxu0 %v4835_v31  ;;  %2199 = vmatpush.bf16.msra.mxu3 %v4829_v21 }
 0x3e8   :  { %v1655_v46 = vadd.f32 %v1654_v39, %v1636_v41  ;;  %1937 = vmatmul.bf16.vlgmr.msra.gmra.mxu1 %v1707_v42  ;;  %v1700_v0 = vsel %vm220_vm7, %v1694_v55, %v1695_v51  ;;  %v1688_v56 = vsel %vm207_vm8, %v1682_v45, %v1683_v7  ;;  %v4843_v39 = vld [vmem:[#allocation2 + $0x528] sm:$0xff]  ;;  %v4828_v41 = vld [vmem:[#allocation2 + $0x4b0] sm:$0xff]  ;;  %v4842_v42 = vld [vmem:[#allocation2 + $0x520] sm:$0xff] }
 0x3e9   :  { %2239 = vmatpush.bf16.msrb.mxu1 %v4843_v39 }
 0x3ea   :  { %v1674_v47 = vadd.f32 %v1673_v43, %v1655_v46  ;;  %v4830_v43 = vld [vmem:[#allocation2 + $0x4c0] sm:$0xff]  ;;  %v4827_v46 = vld [vmem:[#allocation2 + $0x4a8] sm:$0xff] }
 0x3eb   :  { %v1675_v61 = vpop.f32.mrf.mxu3  ;;  %2221 = vmatpush.bf16.msrb.mxu0 %v4834_v32  ;;  %2200 = vmatpush.bf16.msra.mxu3 %v4828_v41 }
 0x3ec   :  { %v1680_v49 = vmax.f32 %v1674_v47, 0.0  ;;  %v4841_v47 = vld [vmem:[#allocation2 + $0x518] sm:$0xff] }
 0x3ed   :  { %v1637_v50 = vpop.f32.mrf.mxu1  ;;  %2240 = vmatpush.bf16.msrb.mxu1 %v4842_v42 }
 0x3ee   :  { %v1696_v52 = vrot.slane %v1680_v49, 1  ;;  %v1638_v53 = vadd.f32 %v4962_v23, %v1637_v50  ;;  %v1684_v23 = vrot.slane %v1680_v49, 7  ;;  %v4840_v50 = vld [vmem:[#allocation2 + $0x510] sm:$0xff] }
 0x3ef   :  { %2222 = vmatpush.bf16.msrb.mxu0 %v4833_v34  ;;  %2201 = vmatpush.bf16.msra.mxu3 %v4827_v46 }
 0x3f0   :  { %v1657_v58 = vadd.f32 %v1656_v54, %v1638_v53  ;;  %v1699_v60 = vsel %vm220_vm7, %v1695_v51, %v1696_v52  ;;  %v1687_v25 = vsel %vm207_vm8, %v1683_v7, %v1684_v23  ;;  %v4825_v51 = vld [vmem:[#allocation2 + $0x498] sm:$0xff]  ;;  %v4824_v54 = vld [vmem:[#allocation2 + $0x490] sm:$0xff] }
 0x3f1   :  { %v1703_v62 = vmul.f32 %v5137_v16, %v1699_v60  ;;  %v1692_v27 = vmul.f32 %v5135_v15, %v1687_v25  ;;  %2241 = vmatpush.bf16.msrb.mxu1 %v4841_v47  ;;  %v4963_v60 = vld [vmem:[%s5580_s2 + $0x5] ss:$0 sm:$0xff] }
 0x3f2   :  { %v1676_v63 = vadd.f32 %v1675_v61, %v1657_v58 }
 0x3f3   :  { %v1708_v3 = vpack.c.bf16 %v1703_v62, %v1700_v0  ;;  %2223 = vmatpush.bf16.msrb.mxu0 %v4832_v38  ;;  %v4823_v62 = vld [vmem:[#allocation2 + $0x488] sm:$0xff]  ;;  %v4822_v0 = vld [vmem:[#allocation2 + $0x480] sm:$0xff] }
 0x3f4   :  { %v1681_v6 = vmax.f32 %v1676_v63, 0.0 }
 0x3f5   :  { %1956 = vmatmul.bf16.vlgmr.msra.gmra.mxu2 %v1708_v3  ;;  %2242 = vmatpush.bf16.msrb.mxu1 %v4840_v50 }
 0x3f6   :  { %v1685_v8 = vrot.slane %v1681_v6, 7  ;;  %v1710_v9 = vpack.c.bf16 %v1681_v6, %v1680_v49  ;;  %v1697_v11 = vrot.slane %v1681_v6, 1  ;;  %v4826_v49 = vld [vmem:[#allocation2 + $0x4a0] sm:$0xff] }
 0x3f7   :  { %2224 = vmatpush.bf16.msrb.mxu0 %v4831_v40  ;;  %2202 = vmatpush.bf16.msra.mxu3 %v4826_v49 }
 0x3f8   :  { %1942 = vmatmul.bf16.gmra.mxu1 %v1710_v9  ;;  %v1689_v10 = vsel %vm207_vm8, %v1685_v8, %v1682_v45  ;;  %v1701_v57 = vsel %vm220_vm7, %v1697_v11, %v1694_v55  ;;  %v1698_v22 = vsel %vm220_vm7, %v1696_v52, %v1697_v11  ;;  %v1686_v26 = vsel %vm207_vm8, %v1684_v23, %v1685_v8  ;;  %v4839_v52 = vld [vmem:[#allocation2 + $0x508] sm:$0xff]  ;;  %v4838_v55 = vld [vmem:[#allocation2 + $0x500] sm:$0xff] }
 0x3f9   :  { %v1690_v14 = vmul.f32 %v5132_v13, %v1689_v10  ;;  %v1705_v18 = vmul.f32 %v5139_v17, %v1701_v57  ;;  %v1709_v4 = vpack.c.bf16 %v1686_v26, %v1692_v27  ;;  %2243 = vmatpush.bf16.msrb.mxu1 %v4839_v52 }
 0x3fb   :  { %v1706_v48 = vpack.c.bf16 %v1688_v56, %v1690_v14  ;;  %v1711_v24 = vpack.c.bf16 %v1705_v18, %v1698_v22  ;;  %2225 = vmatpush.bf16.msrb.mxu0 %v4830_v43  ;;  %2203 = vmatpush.bf16.msra.mxu3 %v4825_v51 }
 0x3fd   :  { %1918 = vmatmul.bf16.vlgmr.msra.gmra.mxu0 %v1706_v48  ;;  %2244 = vmatpush.bf16.msrb.mxu1 %v4838_v55 }
 0x3ff   :  { %2204 = vmatpush.bf16.msra.mxu3 %v4824_v54 }
 0x403   :  { %2205 = vmatpush.bf16.msra.mxu3 %v4823_v62  ;;  %v4861_v62 = vld [vmem:[#allocation2 + $0x5b8] sm:$0xff] }
 0x405   :  { %1961 = vmatmul.bf16.gmra.mxu2 %v1711_v24 }
 0x407   :  { %2206 = vmatpush.bf16.msra.mxu3 %v4822_v0  ;;  %v4859_v0 = vld [vmem:[#allocation2 + $0x5a8] sm:$0xff] }
 0x40b   :  { %2507 = vmatpush.bf16.msrb.mxu3 %v4861_v62 }
 0x40d   :  { %1923 = vmatmul.bf16.gmra.mxu0 %v1709_v4 }
 0x465   :  { %v1938_v53 = vpop.f32.mrf.mxu1 }
 0x46d   :  { %v1940_v3 = vpop.f32.mrf.mxu1 }
 0x475   :  { %v1943_v48 = vpop.f32.mrf.mxu1 }
 0x478   :  { %v1957_v58 = vpop.f32.mrf.mxu2 }
 0x47a   :  { %v1919_v61 = vpop.f32.mrf.mxu0 }
 0x47b   :  { %v1920_v63 = vadd.f32 %v4963_v60, %v1919_v61 }
 0x47d   :  { %v1939_v6 = vadd.f32 %v1938_v53, %v1920_v63  ;;  %v1945_v29 = vpop.f32.mrf.mxu1  ;;  %v4860_v63 = vld [vmem:[#allocation2 + $0x5b0] sm:$0xff] }
 0x47e   :  { %2508 = vmatpush.bf16.msrb.mxu3 %v4860_v63 }
 0x47f   :  { %v1958_v9 = vadd.f32 %v1957_v58, %v1939_v6  ;;  %v4869_v6 = vld [vmem:[#allocation2 + $0x5f8] sm:$0xff] }
 0x480   :  { %v1959_v45 = vpop.f32.mrf.mxu2  ;;  %2526 = vmatpush.bf16.msra.mxu0 %v4869_v6 }
 0x481   :  { %v5380_v14 = vadd.f32 %v1958_v9, %v5310_v5  ;;  %v4853_v9 = vld [vmem:[#allocation2 + $0x578] sm:$0xff] }
 0x482   :  { %v1921_v7 = vpop.f32.mrf.mxu0  ;;  %2509 = vmatpush.bf16.msrb.mxu3 %v4859_v0  ;;  %2488 = vmatpush.bf16.msrb.mxu2 %v4853_v9 }
 0x483   :  { %v1922_v8 = vadd.f32 %v4963_v60, %v1921_v7  ;;  %v1983_v31 = vrot.slane %v5380_v14, 1  ;;  %v1971_v41 = vrot.slane %v5380_v14, 7  ;;  %v4868_v7 = vld [vmem:[#allocation2 + $0x5f0] sm:$0xff] }
 0x484   :  { %2527 = vmatpush.bf16.msra.mxu0 %v4868_v7 }
 0x485   :  { %v1941_v10 = vadd.f32 %v1940_v3, %v1922_v8  ;;  %v4858_v3 = vld [vmem:[#allocation2 + $0x5a0] sm:$0xff]  ;;  %v4856_v8 = vld [vmem:[#allocation2 + $0x590] sm:$0xff] }
 0x486   :  { %2510 = vmatpush.bf16.msrb.mxu3 %v4858_v3 }
 0x487   :  { %v1960_v11 = vadd.f32 %v1959_v45, %v1941_v10  ;;  %v4857_v45 = vld [vmem:[#allocation2 + $0x598] sm:$0xff]  ;;  %v4867_v10 = vld [vmem:[#allocation2 + $0x5e8] sm:$0xff] }
 0x488   :  { %v1962_v23 = vpop.f32.mrf.mxu2  ;;  %2528 = vmatpush.bf16.msra.mxu0 %v4867_v10 }
 0x489   :  { %v5383_v56 = vadd.f32 %v1960_v11, %v5313_v44  ;;  %v4855_v11 = vld [vmem:[#allocation2 + $0x588] sm:$0xff] }
 0x48a   :  { %v1924_v57 = vpop.f32.mrf.mxu0  ;;  %2511 = vmatpush.bf16.msrb.mxu3 %v4857_v45 }
 0x48b   :  { %v1925_v18 = vadd.f32 %v4963_v60, %v1924_v57  ;;  %v1996_v22 = vpack.c.bf16 %v5383_v56, %v5380_v14  ;;  %v1984_v44 = vrot.slane %v5383_v56, 1  ;;  %v1972_v42 = vrot.slane %v5383_v56, 7  ;;  %v4866_v57 = vld [vmem:[#allocation2 + $0x5e0] sm:$0xff] }
 0x48c   :  { %2529 = vmatpush.bf16.msra.mxu0 %v4866_v57 }
 0x48d   :  { %v1944_v24 = vadd.f32 %v1943_v48, %v1925_v18  ;;  %2226 = vmatmul.bf16.vlgmr.msrb.gmra.mxu0 %v1996_v22  ;;  %v4852_v48 = vld [vmem:[#allocation2 + $0x570] sm:$0xff]  ;;  %v4854_v18 = vld [vmem:[#allocation2 + $0x580] sm:$0xff]  ;;  %v4851_v22 = vld [vmem:[#allocation2 + $0x568] sm:$0xff] }
 0x48e   :  { %2512 = vmatpush.bf16.msrb.mxu3 %v4856_v8  ;;  %2489 = vmatpush.bf16.msrb.mxu2 %v4852_v48 }
 0x48f   :  { %v1963_v25 = vadd.f32 %v1962_v23, %v1944_v24  ;;  %v4865_v23 = vld [vmem:[#allocation2 + $0x5d8] sm:$0xff]  ;;  %v4850_v24 = vld [vmem:[#allocation2 + $0x560] sm:$0xff] }
 0x490   :  { %v1964_v33 = vpop.f32.mrf.mxu2  ;;  %2530 = vmatpush.bf16.msra.mxu0 %v4865_v23 }
 0x491   :  { %v5388_v26 = vadd.f32 %v1963_v25, %v5318_v12  ;;  %v1989_v12 = vsel %vm220_vm7, %v1983_v31, %v1984_v44  ;;  %v4864_v25 = vld [vmem:[#allocation2 + $0x5d0] sm:$0xff] }
 0x492   :  { %v1926_v27 = vpop.f32.mrf.mxu0  ;;  %2513 = vmatpush.bf16.msrb.mxu3 %v4855_v11  ;;  %2490 = vmatpush.bf16.msrb.mxu2 %v4851_v22 }
 0x493   :  { %v1985_v5 = vrot.slane %v5388_v26, 1  ;;  %v1927_v4 = vadd.f32 %v4963_v60, %v1926_v27  ;;  %v1973_v53 = vrot.slane %v5388_v26, 7  ;;  %v4849_v27 = vld [vmem:[#allocation2 + $0x558] sm:$0xff] }
 0x494   :  { %2531 = vmatpush.bf16.msra.mxu0 %v4864_v25 }
 0x495   :  { %v1946_v30 = vadd.f32 %v1945_v29, %v1927_v4  ;;  %v1988_v32 = vsel %vm220_vm7, %v1984_v44, %v1985_v5  ;;  %v1976_v55 = vsel %vm207_vm8, %v1972_v42, %v1973_v53  ;;  %v4848_v44 = vld [vmem:[#allocation2 + $0x550] sm:$0xff]  ;;  %v4862_v29 = vld [vmem:[#allocation2 + $0x5c0] sm:$0xff] }
 0x496   :  { %v1992_v34 = vmul.f32 %v5137_v16, %v1988_v32  ;;  %v1981_v60 = vmul.f32 %v5135_v15, %v1976_v55  ;;  %2514 = vmatpush.bf16.msrb.mxu3 %v4854_v18  ;;  %2491 = vmatpush.bf16.msrb.mxu2 %v4850_v24 }
 0x497   :  { %v1965_v37 = vadd.f32 %v1964_v33, %v1946_v30  ;;  %v4847_v33 = vld [vmem:[#allocation2 + $0x548] sm:$0xff] }
 0x498   :  { %v1997_v38 = vpack.c.bf16 %v1992_v34, %v1989_v12 }
 0x499   :  { %v5399_v21 = vadd.f32 %v1965_v37, %v5329_v59  ;;  %v1977_v59 = vsel %vm207_vm8, %v1971_v41, %v1972_v42  ;;  %v4846_v37 = vld [vmem:[#allocation2 + $0x540] sm:$0xff] }
 0x49a   :  { %2245 = vmatmul.bf16.vlgmr.msrb.gmra.mxu1 %v1997_v38  ;;  %2492 = vmatpush.bf16.msrb.mxu2 %v4849_v27 }
 0x49b   :  { %v1974_v39 = vrot.slane %v5399_v21, 7  ;;  %v1999_v40 = vpack.c.bf16 %v5399_v21, %v5388_v26  ;;  %v1986_v46 = vrot.slane %v5399_v21, 1 }
 0x49d   :  { %2231 = vmatmul.bf16.gmra.mxu0 %v1999_v40  ;;  %v1978_v43 = vsel %vm207_vm8, %v1974_v39, %v1971_v41  ;;  %v1990_v50 = vsel %vm220_vm7, %v1986_v46, %v1983_v31  ;;  %v1987_v52 = vsel %vm220_vm7, %v1985_v5, %v1986_v46  ;;  %v1975_v58 = vsel %vm207_vm8, %v1973_v53, %v1974_v39  ;;  %v4863_v5 = vld [vmem:[#allocation2 + $0x5c8] sm:$0xff]  ;;  %v4964_v31 = vld [vmem:[%s5580_s2 + $0x6] ss:$0 sm:$0xff] }
 0x49e   :  { %v1979_v47 = vmul.f32 %v5132_v13, %v1978_v43  ;;  %v1994_v51 = vmul.f32 %v5139_v17, %v1990_v50  ;;  %v1998_v61 = vpack.c.bf16 %v1975_v58, %v1981_v60  ;;  %2532 = vmatpush.bf16.msra.mxu0 %v4863_v5  ;;  %2493 = vmatpush.bf16.msrb.mxu2 %v4848_v44 }
 0x4a0   :  { %v1995_v49 = vpack.c.bf16 %v1977_v59, %v1979_v47  ;;  %v2000_v54 = vpack.c.bf16 %v1994_v51, %v1987_v52 }
 0x4a2   :  { %2207 = vmatmul.bf16.vlgmr.msra.gmra.mxu3 %v1995_v49  ;;  %2533 = vmatpush.bf16.msra.mxu0 %v4862_v29 }
 0x4a3   :  { %2494 = vmatpush.bf16.msrb.mxu2 %v4847_v33 }
 0x4a7   :  { %2495 = vmatpush.bf16.msrb.mxu2 %v4846_v37 }
 0x4aa   :  { %2250 = vmatmul.bf16.gmra.mxu1 %v2000_v54 }
 0x4b2   :  { %2212 = vmatmul.bf16.gmra.mxu3 %v1998_v61 }
 0x50a   :  { %v2227_v4 = vpop.f32.mrf.mxu0 }
 0x512   :  { %v2229_v12 = vpop.f32.mrf.mxu0 }
 0x517   :  { %v2246_v30 = vpop.f32.mrf.mxu1 }
 0x51a   :  { %v2232_v49 = vpop.f32.mrf.mxu0 }
 0x51f   :  { %v2248_v39 = vpop.f32.mrf.mxu1 }
 0x522   :  { %v2234_v0 = vpop.f32.mrf.mxu0 }
 0x525   :  { %v2208_v32 = vpop.f32.mrf.mxu3 }
 0x526   :  { %v2209_v34 = vadd.f32 %v4964_v31, %v2208_v32 }
 0x527   :  { %v2251_v53 = vpop.f32.mrf.mxu1 }
 0x528   :  { %v2228_v38 = vadd.f32 %v2227_v4, %v2209_v34 }
 0x52a   :  { %v2247_v42 = vadd.f32 %v2246_v30, %v2228_v38 }
 0x52c   :  { %v2256_v47 = vmax.f32 %v2247_v42, 0.0 }
 0x52d   :  { %v2210_v40 = vpop.f32.mrf.mxu3 }
 0x52e   :  { %v2211_v41 = vadd.f32 %v4964_v31, %v2210_v40  ;;  %v2272_v3 = vrot.slane %v2256_v47, 1  ;;  %v2260_v57 = vrot.slane %v2256_v47, 7 }
 0x52f   :  { %v2253_v7 = vpop.f32.mrf.mxu1 }
 0x530   :  { %v2230_v43 = vadd.f32 %v2229_v12, %v2211_v41  ;;  %v4965_v41 = vld [vmem:[%s5580_s2 + $0x7] ss:$0 sm:$0xff] }
 0x532   :  { %v2249_v46 = vadd.f32 %v2248_v39, %v2230_v43 }
 0x534   :  { %v2257_v59 = vmax.f32 %v2249_v46, 0.0 }
 0x535   :  { %v2213_v50 = vpop.f32.mrf.mxu3 }
 0x536   :  { %v2214_v51 = vadd.f32 %v4964_v31, %v2213_v50  ;;  %v2285_v52 = vpack.c.bf16 %v2257_v59, %v2256_v47  ;;  %v2273_v61 = vrot.slane %v2257_v59, 1  ;;  %v2261_v18 = vrot.slane %v2257_v59, 7 }
 0x538   :  { %v2233_v54 = vadd.f32 %v2232_v49, %v2214_v51  ;;  %2515 = vmatmul.bf16.vlgmr.msrb.gmra.mxu3 %v2285_v52  ;;  %v2278_v10 = vsel %vm220_vm7, %v2272_v3, %v2273_v61  ;;  %v2266_v5 = vsel %vm207_vm8, %v2260_v57, %v2261_v18 }
 0x53a   :  { %v2252_v55 = vadd.f32 %v2251_v53, %v2233_v54 }
 0x53c   :  { %v2258_v58 = vmax.f32 %v2252_v55, 0.0 }
 0x53d   :  { %v2215_v60 = vpop.f32.mrf.mxu3 }
 0x53e   :  { %v2274_v62 = vrot.slane %v2258_v58, 1  ;;  %v2216_v63 = vadd.f32 %v4964_v31, %v2215_v60  ;;  %v2262_v31 = vrot.slane %v2258_v58, 7  ;;  %v2549_v60 = vld [vmem:[%s5583_s5] sm:$0xff] }
 0x540   :  { %v2277_v6 = vsel %vm220_vm7, %v2273_v61, %v2274_v62  ;;  %v2235_v45 = vadd.f32 %v2234_v0, %v2216_v63  ;;  %v2265_v33 = vsel %vm207_vm8, %v2261_v18, %v2262_v31 }
 0x541   :  { %v2281_v8 = vmul.f32 %v5137_v16, %v2277_v6  ;;  %v2270_v37 = vmul.f32 %v5135_v15, %v2265_v33  ;;  %v4896_v33 = vld [vmem:[#allocation5 + $0x10] sm:$0xff] }
 0x542   :  { %v2254_v9 = vadd.f32 %v2253_v7, %v2235_v45 }
 0x543   :  { %v2286_v11 = vpack.c.bf16 %v2281_v8, %v2278_v10 }
 0x544   :  { %v2259_v48 = vmax.f32 %v2254_v9, 0.0 }
 0x545   :  { %2534 = vmatmul.bf16.vlgmr.msra.gmra.mxu0 %v2286_v11  ;;  %v2551_v11 = vld [vmem:[%s5583_s5 + $0x10] sm:$0xff] }
 0x546   :  { %v2263_v22 = vrot.slane %v2259_v48, 7  ;;  %v2288_v23 = vpack.c.bf16 %v2259_v48, %v2258_v58  ;;  %v2275_v25 = vrot.slane %v2259_v48, 1 }
 0x548   :  { %2520 = vmatmul.bf16.gmra.mxu3 %v2288_v23  ;;  %v2267_v24 = vsel %vm207_vm8, %v2263_v22, %v2260_v57  ;;  %v2279_v44 = vsel %vm220_vm7, %v2275_v25, %v2272_v3  ;;  %v2276_v30 = vsel %vm220_vm7, %v2274_v62, %v2275_v25  ;;  %v2264_v34 = vsel %vm207_vm8, %v2262_v31, %v2263_v22  ;;  %v2550_v3 = vld [vmem:[%s5583_s5 + $0x8] sm:$0xff]  ;;  %v2595_v23 = vld [vmem:[%s5584_s6] sm:$0xff]  ;;  %v4897_v31 = vld [vmem:[#allocation5 + $0x18] sm:$0xff] }
 0x549   :  { %v2268_v27 = vmul.f32 %v5132_v13, %v2267_v24  ;;  %v2283_v29 = vmul.f32 %v5139_v17, %v2279_v44  ;;  %v2287_v12 = vpack.c.bf16 %v2264_v34, %v2270_v37  ;;  %v2596_v25 = vld [vmem:[%s5584_s6 + $0x8] sm:$0xff]  ;;  %v4900_v44 = vld [vmem:[#allocation5 + $0x30] sm:$0xff]  ;;  %v4893_v34 = vld [vmem:[#allocation2 + $0x6b8] sm:$0xff] }
 0x54a   :  { %v4884_v37 = vld [vmem:[#allocation2 + $0x670] sm:$0xff] }
 0x54b   :  { %v2284_v4 = vpack.c.bf16 %v2266_v5, %v2268_v27  ;;  %v2289_v32 = vpack.c.bf16 %v2283_v29, %v2276_v30  ;;  %v4899_v29 = vld [vmem:[#allocation5 + $0x28] sm:$0xff]  ;;  %v4898_v30 = vld [vmem:[#allocation5 + $0x20] sm:$0xff] }
 0x54d   :  { %2496 = vmatmul.bf16.vlgmr.msrb.gmra.mxu2 %v2284_v4  ;;  %v4901_v4 = vld [vmem:[#allocation5 + $0x38] sm:$0xff] }
 0x555   :  { %2539 = vmatmul.bf16.gmra.mxu0 %v2289_v32  ;;  %v4885_v32 = vld [vmem:[#allocation2 + $0x678] sm:$0xff] }
 0x55d   :  { %2501 = vmatmul.bf16.gmra.mxu2 %v2287_v12  ;;  %v4895_v12 = vld [vmem:[#allocation5 + $0x8] sm:$0xff] }
 0x5bb   :  { %v2516_v38 = vpop.f32.mrf.mxu3 }
 0x5c2   :  { %v2535_v39 = vpop.f32.mrf.mxu0 }
 0x5c3   :  { %v2518_v43 = vpop.f32.mrf.mxu3 }
 0x5ca   :  { %v2537_v46 = vpop.f32.mrf.mxu0 }
 0x5cb   :  { %v2521_v54 = vpop.f32.mrf.mxu3 }
 0x5d0   :  { %v2497_v40 = vpop.f32.mrf.mxu2 }
 0x5d1   :  { %v2498_v42 = vadd.f32 %v4965_v41, %v2497_v40  ;;  %v4882_v40 = vld [vmem:[#allocation2 + $0x660] sm:$0xff] }
 0x5d2   :  { %v2540_v61 = vpop.f32.mrf.mxu0 }
 0x5d3   :  { %v2517_v59 = vadd.f32 %v2516_v38, %v2498_v42  ;;  %v4883_v38 = vld [vmem:[#allocation2 + $0x668] sm:$0xff]  ;;  %v4892_v42 = vld [vmem:[#allocation2 + $0x6b0] sm:$0xff] }
 0x5d5   :  { %v2536_v51 = vadd.f32 %v2535_v39, %v2517_v59  ;;  %v4894_v39 = vld [vmem:[#allocation5] sm:$0xff]  ;;  %v4879_v59 = vld [vmem:[#allocation2 + $0x648] sm:$0xff] }
 0x5d7   :  { %v5454_v58 = vadd.f32 %v2536_v51, %v5380_v14  ;;  %v2523_v14 = vpop.f32.mrf.mxu3  ;;  %v4878_v51 = vld [vmem:[#allocation2 + $0x640] sm:$0xff] }
 0x5d8   :  { %v2499_v47 = vpop.f32.mrf.mxu2 }
 0x5d9   :  { %v2500_v49 = vadd.f32 %v4965_v41, %v2499_v47  ;;  %v4891_v47 = vld [vmem:[#allocation2 + $0x6a8] sm:$0xff] }
 0x5da   :  { %v2542_v45 = vpop.f32.mrf.mxu0 }
 0x5db   :  { %v2519_v50 = vadd.f32 %v2518_v43, %v2500_v49  ;;  %v4880_v43 = vld [vmem:[#allocation2 + $0x650] sm:$0xff] }
 0x5dc   :  { %v4876_v49 = vld [vmem:[#allocation2 + $0x630] sm:$0xff] }
 0x5dd   :  { %v2538_v52 = vadd.f32 %v2537_v46, %v2519_v50  ;;  %v4877_v46 = vld [vmem:[#allocation2 + $0x638] sm:$0xff]  ;;  %v4890_v50 = vld [vmem:[#allocation2 + $0x6a0] sm:$0xff] }
 0x5df   :  { %v5450_v53 = vadd.f32 %v2538_v52, %v5383_v56  ;;  %v4889_v52 = vld [vmem:[#allocation2 + $0x698] sm:$0xff] }
 0x5e0   :  { %v2502_v55 = vpop.f32.mrf.mxu2 }
 0x5e1   :  { %2580 = vmatpush.msra.mxu1 %v5450_v53  ;;  %v2503_v62 = vadd.f32 %v4965_v41, %v2502_v55  ;;  %v4888_v55 = vld [vmem:[#allocation2 + $0x690] sm:$0xff] }
 0x5e3   :  { %2581 = vmatpush.msra.mxu1 %v5454_v58  ;;  %v2522_v63 = vadd.f32 %v2521_v54, %v2503_v62  ;;  %v4874_v54 = vld [vmem:[#allocation2 + $0x620] sm:$0xff]  ;;  %v4887_v62 = vld [vmem:[#allocation2 + $0x688] sm:$0xff] }
 0x5e4   :  { %4377 = vmatmul.msk.f32.vlgmr.msra.gmra.mxu1 %vm2553_vm9, %v2549_v60 }
 0x5e5   :  { %v2541_v7 = vadd.f32 %v2540_v61, %v2522_v63  ;;  %2917 = vmatpush.bf16.msrb.mxu1 %v4877_v46  ;;  %v4873_v61 = vld [vmem:[#allocation2 + $0x618] sm:$0xff]  ;;  %v4872_v63 = vld [vmem:[#allocation2 + $0x610] sm:$0xff] }
 0x5e7   :  { %v5470_v10 = vadd.f32 %v2541_v7, %v5388_v26  ;;  %v2597_v7 = vld [vmem:[%s5585_s7] sm:$0xff] }
 0x5e8   :  { %v2504_v56 = vpop.f32.mrf.mxu2 }
 0x5e9   :  { %v2505_v0 = vadd.f32 %v4965_v41, %v2504_v56  ;;  %v4881_v41 = vld [vmem:[#allocation2 + $0x658] sm:$0xff]  ;;  %2918 = vmatpush.bf16.msrb.mxu1 %v4876_v49  ;;  %v4915_v56 = vld [vmem:[#allocation5 + $0xa8] sm:$0xff] }
 0x5eb   :  { %v2524_v6 = vadd.f32 %v2523_v14, %v2505_v0  ;;  %v4886_v0 = vld [vmem:[#allocation2 + $0x680] sm:$0xff]  ;;  %v4871_v14 = vld [vmem:[#allocation2 + $0x608] sm:$0xff] }
 0x5ec   :  { %4378 = vmatmul.msk.f32.gmra.mxu1 %vm2553_vm9, %v2550_v3 }
 0x5ed   :  { %v2543_v8 = vadd.f32 %v2542_v45, %v2524_v6  ;;  %v4913_v45 = vld [vmem:[#allocation5 + $0x98] sm:$0xff] }
 0x5ef   :  { %v5466_v9 = vadd.f32 %v2543_v8, %v5399_v21  ;;  %v2552_v21 = vld [vmem:[%s5583_s5 + $0x18] sm:$0xff]  ;;  %v4870_v8 = vld [vmem:[#allocation2 + $0x600] sm:$0xff] }
 0x5f1   :  { %2645 = vmatpush.msra.mxu3 %v5466_v9 }
 0x5f3   :  { %2646 = vmatpush.msra.mxu3 %v5470_v10 }
 0x5f4   :  { %4379 = vmatmul.msk.f32.gmra.mxu1 %vm2553_vm9, %v2551_v11  ;;  %4383 = vmatmul.msk.f32.vlgmr.msra.gmra.mxu3 %vm2553_vm9, %v2549_v60  ;;  %v4916_v60 = vld [vmem:[#allocation5 + $0xb0] sm:$0xff] }
 0x5f5   :  { %2955 = vmatpush.bf16.msrb.mxu3 %v4893_v34 }
 0x5f9   :  { %2956 = vmatpush.bf16.msrb.mxu3 %v4892_v42 }
 0x5fc   :  { %4380 = vmatmul.msk.f32.gmra.mxu1 %vm2553_vm9, %v2552_v21  ;;  %4384 = vmatmul.msk.f32.gmra.mxu3 %vm2553_vm9, %v2550_v3  ;;  %v4914_v3 = vld [vmem:[#allocation5 + $0xa0] sm:$0xff] }
 0x5fd   :  { %2957 = vmatpush.bf16.msrb.mxu3 %v4891_v47 }
 0x601   :  { %2958 = vmatpush.bf16.msrb.mxu3 %v4890_v50 }
 0x604   :  { %4385 = vmatmul.msk.f32.gmra.mxu3 %vm2553_vm9, %v2551_v11 }
 0x605   :  { %2959 = vmatpush.bf16.msrb.mxu3 %v4889_v52 }
 0x609   :  { %2960 = vmatpush.bf16.msrb.mxu3 %v4888_v55 }
 0x60c   :  { %4386 = vmatmul.msk.f32.gmra.mxu3 %vm2553_vm9, %v2552_v21  ;;  %v4912_v21 = vld [vmem:[#allocation5 + $0x90] sm:$0xff] }
 0x60d   :  { %2961 = vmatpush.bf16.msrb.mxu3 %v4887_v62 }
 0x611   :  { %2962 = vmatpush.bf16.msrb.mxu3 %v4886_v0 }
 0x661   :  { %v2583_v26 = vpop.f32.mrf.mxu1 }
 0x669   :  { %v2586_v48 = vpop.f32.mrf.mxu1 }
 0x671   :  { %v2589_v57 = vpop.f32.mrf.mxu1 }
 0x677   :  { %v2648_v18 = vpop.f32.mrf.mxu3 }
 0x679   :  { %v2592_v22 = vpop.f32.mrf.mxu1 }
 0x67a   :  { %2618 = vmatpush.msra.mxu2 %v2592_v22  ;;  %v4908_v22 = vld [vmem:[#allocation5 + $0x70] sm:$0xff] }
 0x67c   :  { %2619 = vmatpush.msra.mxu2 %v2589_v57  ;;  %v4911_v57 = vld [vmem:[#allocation5 + $0x88] sm:$0xff] }
 0x67e   :  { %2620 = vmatpush.msra.mxu2 %v2586_v48  ;;  %v4909_v48 = vld [vmem:[#allocation5 + $0x78] sm:$0xff] }
 0x67f   :  { %v2651_v24 = vpop.f32.mrf.mxu3 }
 0x680   :  { %2621 = vmatpush.msra.mxu2 %v2583_v26  ;;  %v2598_v26 = vld [vmem:[%s5585_s7 + $0x8] sm:$0xff] }
 0x681   :  { %4381 = vmatmul.msk.f32.vlgmr.msra.gmra.mxu2 %vm2599_vm10, %v2595_v23 }
 0x682   :  { %2936 = vmatpush.bf16.msrb.mxu2 %v4885_v32  ;;  %v4906_v32 = vld [vmem:[#allocation5 + $0x60] sm:$0xff] }
 0x686   :  { %2937 = vmatpush.bf16.msrb.mxu2 %v4884_v37  ;;  %v4905_v37 = vld [vmem:[#allocation5 + $0x58] sm:$0xff] }
 0x687   :  { %v2654_v27 = vpop.f32.mrf.mxu3 }
 0x689   :  { %4382 = vmatmul.msk.f32.gmra.mxu2 %vm2599_vm10, %v2596_v25 }
 0x68a   :  { %2938 = vmatpush.bf16.msrb.mxu2 %v4883_v38 }
 0x68e   :  { %2939 = vmatpush.bf16.msrb.mxu2 %v4882_v40 }
 0x68f   :  { %v2657_v5 = vpop.f32.mrf.mxu3 }
 0x690   :  { %2672 = vmatpush.msrb.mxu0 %v2657_v5 }
 0x692   :  { %2673 = vmatpush.msrb.mxu0 %v2654_v27  ;;  %2940 = vmatpush.bf16.msrb.mxu2 %v4881_v41  ;;  %v4904_v41 = vld [vmem:[#allocation5 + $0x50] sm:$0xff] }
 0x694   :  { %2674 = vmatpush.msrb.mxu0 %v2651_v24 }
 0x696   :  { %2675 = vmatpush.msrb.mxu0 %v2648_v18  ;;  %2941 = vmatpush.bf16.msrb.mxu2 %v4880_v43 }
 0x697   :  { %4387 = vmatmul.msk.f32.vlgmr.msrb.gmra.mxu0 %vm2599_vm10, %v2595_v23 }
 0x698   :  { %3430 = vmatpush.bf16.msra.mxu0 %v4901_v4  ;;  %v4910_v4 = vld [vmem:[#allocation5 + $0x80] sm:$0xff] }
 0x69a   :  { %2942 = vmatpush.bf16.msrb.mxu2 %v4879_v59  ;;  %v4903_v59 = vld [vmem:[#allocation5 + $0x48] sm:$0xff] }
 0x69c   :  { %3431 = vmatpush.bf16.msra.mxu0 %v4900_v44  ;;  %v4907_v44 = vld [vmem:[#allocation5 + $0x68] sm:$0xff] }
 0x69e   :  { %2943 = vmatpush.bf16.msrb.mxu2 %v4878_v51 }
 0x69f   :  { %4388 = vmatmul.msk.f32.gmra.mxu0 %vm2599_vm10, %v2596_v25 }
 0x6a0   :  { %3432 = vmatpush.bf16.msra.mxu0 %v4899_v29 }
 0x6a4   :  { %3433 = vmatpush.bf16.msra.mxu0 %v4898_v30 }
 0x6a8   :  { %3434 = vmatpush.bf16.msra.mxu0 %v4897_v31 }
 0x6ac   :  { %3435 = vmatpush.bf16.msra.mxu0 %v4896_v33 }
 0x6b0   :  { %3436 = vmatpush.bf16.msra.mxu0 %v4895_v12 }
 0x6b4   :  { %3437 = vmatpush.bf16.msra.mxu0 %v4894_v39 }
 0x6b7   :  { %3438 = vmatmul.bf16.vlgmr.msra.gmra.mxu0 %v5191_v19  ;;  %v4875_v19 = vld [vmem:[#allocation2 + $0x628] sm:$0xff] }
 0x6b8   :  { %2919 = vmatpush.bf16.msrb.mxu1 %v4875_v19 }
 0x6bc   :  { %2920 = vmatpush.bf16.msrb.mxu1 %v4874_v54  ;;  %v4902_v54 = vld [vmem:[#allocation5 + $0x40] sm:$0xff] }
 0x6c0   :  { %2921 = vmatpush.bf16.msrb.mxu1 %v4873_v61 }
 0x6c4   :  { %2922 = vmatpush.bf16.msrb.mxu1 %v4872_v63 }
 0x6c7   :  { %3443 = vmatmul.bf16.gmra.mxu0 %v5207_v35  ;;  %v4917_v35 = vld [vmem:[#allocation5 + $0xb8] sm:$0xff] }
 0x6c8   :  { %3468 = vmatpush.bf16.msra.mxu2 %v4917_v35  ;;  %2923 = vmatpush.bf16.msrb.mxu1 %v4871_v14 }
 0x6cc   :  { %3469 = vmatpush.bf16.msra.mxu2 %v4916_v60  ;;  %2924 = vmatpush.bf16.msrb.mxu1 %v4870_v8  ;;  %v4940_v8 = vld [vmem:[#allocation5 + $0x170] sm:$0xff] }
 0x6d0   :  { %3470 = vmatpush.bf16.msra.mxu2 %v4915_v56  ;;  %3449 = vmatpush.bf16.msra.mxu1 %v4909_v48  ;;  %v4932_v48 = vld [vmem:[#allocation5 + $0x130] sm:$0xff] }
 0x6d4   :  { %3471 = vmatpush.bf16.msra.mxu2 %v4914_v3  ;;  %3450 = vmatpush.bf16.msra.mxu1 %v4908_v22  ;;  %v4930_v22 = vld [vmem:[#allocation5 + $0x120] sm:$0xff] }
 0x6d8   :  { %3472 = vmatpush.bf16.msra.mxu2 %v4913_v45  ;;  %3451 = vmatpush.bf16.msra.mxu1 %v4907_v44 }
 0x6dc   :  { %3473 = vmatpush.bf16.msra.mxu2 %v4912_v21  ;;  %3452 = vmatpush.bf16.msra.mxu1 %v4906_v32  ;;  %v4939_v21 = vld [vmem:[#allocation5 + $0x168] sm:$0xff] }
 0x6dd   :  { %v4967_v32 = vld [vmem:[%s5580_s2 + $0x8] ss:$0 sm:$0xff] }
 0x6e0   :  { %3474 = vmatpush.bf16.msra.mxu2 %v4911_v57  ;;  %3453 = vmatpush.bf16.msra.mxu1 %v4905_v37  ;;  %v4937_v57 = vld [vmem:[#allocation5 + $0x158] sm:$0xff] }
 0x6e4   :  { %3475 = vmatpush.bf16.msra.mxu2 %v4910_v4  ;;  %3454 = vmatpush.bf16.msra.mxu1 %v4904_v41 }
 0x6e8   :  { %3455 = vmatpush.bf16.msra.mxu1 %v4903_v59 }
 0x6ec   :  { %3456 = vmatpush.bf16.msra.mxu1 %v4902_v54 }
 0x704   :  { %v2623_v6 = vpop.f32.mrf.mxu2 }
 0x705   :  { %v2624_v11 = vadd.f32 %v2623_v6, %v2597_v7 }
 0x707   :  { %v2629_v23 = vmax.f32 %v2624_v11, 0.0  ;;  %v4933_v11 = vld [vmem:[#allocation5 + $0x138] sm:$0xff] }
 0x708   :  { %3506 = vmatpush.bf16.msrb.mxu0 %v4933_v11 }
 0x709   :  { %v2685_v27 = vadd.f32 %v2629_v23, %v5454_v58  ;;  %v4936_v23 = vld [vmem:[#allocation5 + $0x150] sm:$0xff] }
 0x70b   :  { %v2701_v58 = vrot.slane %v2685_v27, 1  ;;  %v2689_v49 = vrot.slane %v2685_v27, 7 }
 0x70c   :  { %v2626_v18 = vpop.f32.mrf.mxu2  ;;  %3507 = vmatpush.bf16.msrb.mxu0 %v4932_v48 }
 0x70d   :  { %v2627_v24 = vadd.f32 %v2626_v18, %v2598_v26  ;;  %v4922_v18 = vld [vmem:[#allocation5 + $0xe0] sm:$0xff] }
 0x70f   :  { %v2630_v25 = vmax.f32 %v2627_v24, 0.0 }
 0x711   :  { %v2686_v5 = vadd.f32 %v2630_v25, %v5450_v53  ;;  %v4921_v25 = vld [vmem:[#allocation5 + $0xd8] sm:$0xff] }
 0x713   :  { %v2714_v29 = vpack.c.bf16 %v2686_v5, %v2685_v27  ;;  %v2702_v12 = vrot.slane %v2686_v5, 1  ;;  %v2690_v50 = vrot.slane %v2686_v5, 7  ;;  %v4929_v27 = vld [vmem:[#allocation5 + $0x118] sm:$0xff]  ;;  %v4935_v5 = vld [vmem:[#allocation5 + $0x148] sm:$0xff] }
 0x714   :  { %v2677_v30 = vpop.f32.mrf.mxu0 }
 0x715   :  { %v2678_v31 = vadd.f32 %v2677_v30, %v2597_v7  ;;  %2944 = vmatmul.bf16.vlgmr.msrb.gmra.mxu2 %v2714_v29  ;;  %v2707_v43 = vsel %vm220_vm7, %v2701_v58, %v2702_v12  ;;  %v2695_v60 = vsel %vm207_vm8, %v2689_v49, %v2690_v50  ;;  %v4941_v7 = vld [vmem:[#allocation5 + $0x178] sm:$0xff]  ;;  %v4920_v29 = vld [vmem:[#allocation5 + $0xd0] sm:$0xff] }
 0x716   :  { %4942 = vmatpush.bf16.msrb.mxu2 %v4941_v7  ;;  %v4928_v30 = vld [vmem:[#allocation5 + $0x110] sm:$0xff] }
 0x717   :  { %v2683_v33 = vmax.f32 %v2678_v31, 0.0  ;;  %v4934_v31 = vld [vmem:[#allocation5 + $0x140] sm:$0xff] }
 0x719   :  { %v2687_v34 = vadd.f32 %v2683_v33, %v5470_v10  ;;  %v4919_v33 = vld [vmem:[#allocation5 + $0xc8] sm:$0xff] }
 0x71a   :  { %4943 = vmatpush.bf16.msrb.mxu2 %v4940_v8 }
 0x71b   :  { %v2703_v38 = vrot.slane %v2687_v34, 1  ;;  %v2691_v56 = vrot.slane %v2687_v34, 7 }
 0x71c   :  { %v2680_v39 = vpop.f32.mrf.mxu0 }
 0x71d   :  { %v2706_v53 = vsel %vm220_vm7, %v2702_v12, %v2703_v38  ;;  %v2681_v40 = vadd.f32 %v2680_v39, %v2598_v26  ;;  %v2694_v3 = vsel %vm207_vm8, %v2690_v50, %v2691_v56  ;;  %v4924_v26 = vld [vmem:[#allocation5 + $0xf0] sm:$0xff] }
 0x71e   :  { %v2710_v42 = vmul.f32 %v5137_v16, %v2706_v53  ;;  %v2699_v6 = vmul.f32 %v5135_v15, %v2694_v3  ;;  %4944 = vmatpush.bf16.msrb.mxu2 %v4939_v21  ;;  %v4926_v53 = vld [vmem:[#allocation5 + $0x100] sm:$0xff] }
 0x71f   :  { %v2684_v46 = vmax.f32 %v2681_v40, 0.0 }
 0x720   :  { %v2715_v47 = vpack.c.bf16 %v2710_v42, %v2707_v43 }
 0x721   :  { %v2688_v10 = vadd.f32 %v2684_v46, %v5466_v9 }
 0x722   :  { %2963 = vmatmul.bf16.vlgmr.msrb.gmra.mxu3 %v2715_v47 }
 0x723   :  { %v2692_v51 = vrot.slane %v2688_v10, 7  ;;  %v2717_v19 = vpack.c.bf16 %v2688_v10, %v2687_v34  ;;  %v2704_v35 = vrot.slane %v2688_v10, 1  ;;  %v4927_v34 = vld [vmem:[#allocation5 + $0x108] sm:$0xff] }
 0x725   :  { %v2696_v52 = vsel %vm207_vm8, %v2692_v51, %v2689_v49  ;;  %2949 = vmatmul.bf16.gmra.mxu2 %v2717_v19  ;;  %v2708_v9 = vsel %vm220_vm7, %v2704_v35, %v2701_v58  ;;  %v2705_v63 = vsel %vm220_vm7, %v2703_v38, %v2704_v35  ;;  %v2693_v14 = vsel %vm207_vm8, %v2691_v56, %v2692_v51  ;;  %v4918_v58 = vld [vmem:[#allocation5 + $0xc0] sm:$0xff] }
 0x726   :  { %v2697_v55 = vmul.f32 %v5132_v13, %v2696_v52  ;;  %v2712_v62 = vmul.f32 %v5139_v17, %v2708_v9  ;;  %v2716_v45 = vpack.c.bf16 %v2693_v14, %v2699_v6 }
 0x728   :  { %v2713_v61 = vpack.c.bf16 %v2695_v60, %v2697_v55  ;;  %v2718_v0 = vpack.c.bf16 %v2712_v62, %v2705_v63 }
 0x72a   :  { %2925 = vmatmul.bf16.vlgmr.msrb.gmra.mxu1 %v2713_v61 }
 0x72b   :  { %3525 = vmatpush.bf16.msrb.mxu1 %v4941_v7 }
 0x72f   :  { %3526 = vmatpush.bf16.msrb.mxu1 %v4940_v8 }
 0x732   :  { %2968 = vmatmul.bf16.gmra.mxu3 %v2718_v0 }
 0x733   :  { %3527 = vmatpush.bf16.msrb.mxu1 %v4939_v21 }
 0x735   :  { %3476 = vmatmul.bf16.vlgmr.msra.gmra.mxu2 %v5177_v2  ;;  %v4925_v2 = vld [vmem:[#allocation5 + $0xf8] sm:$0xff] }
 0x736   :  { %3487 = vmatpush.bf16.msra.mxu3 %v4925_v2 }
 0x73a   :  { %2930 = vmatmul.bf16.gmra.mxu1 %v2716_v45  ;;  %3488 = vmatpush.bf16.msra.mxu3 %v4924_v26 }
 0x745   :  { %3481 = vmatmul.bf16.gmra.mxu2 %v5202_v28  ;;  %v4938_v28 = vld [vmem:[#allocation5 + $0x160] sm:$0xff] }
 0x746   :  { %3528 = vmatpush.bf16.msrb.mxu1 %v4938_v28  ;;  %4945 = vmatpush.bf16.msrb.mxu2 %v4938_v28 }
 0x74a   :  { %3457 = vmatmul.bf16.vlgmr.msra.gmra.mxu1 %v5193_v20  ;;  %v4923_v20 = vld [vmem:[#allocation5 + $0xe8] sm:$0xff]  ;;  %4946 = vmatpush.bf16.msrb.mxu2 %v4937_v57 }
 0x74b   :  { %3489 = vmatpush.bf16.msra.mxu3 %v4923_v20  ;;  %3529 = vmatpush.bf16.msrb.mxu1 %v4937_v57 }
 0x74e   :  { %4947 = vmatpush.bf16.msrb.mxu2 %v4936_v23 }
 0x74f   :  { %3490 = vmatpush.bf16.msra.mxu3 %v4922_v18  ;;  %3530 = vmatpush.bf16.msrb.mxu1 %v4936_v23 }
 0x752   :  { %4948 = vmatpush.bf16.msrb.mxu2 %v4935_v5 }
 0x753   :  { %3491 = vmatpush.bf16.msra.mxu3 %v4921_v25  ;;  %3531 = vmatpush.bf16.msrb.mxu1 %v4935_v5 }
 0x756   :  { %4949 = vmatpush.bf16.msrb.mxu2 %v4934_v31 }
 0x757   :  { %3492 = vmatpush.bf16.msra.mxu3 %v4920_v29  ;;  %3532 = vmatpush.bf16.msrb.mxu1 %v4934_v31 }
 0x75a   :  { %3462 = vmatmul.bf16.gmra.mxu1 %v5209_v36  ;;  %v4931_v36 = vld [vmem:[#allocation5 + $0x128] sm:$0xff] }
 0x75b   :  { %3508 = vmatpush.bf16.msrb.mxu0 %v4931_v36  ;;  %3493 = vmatpush.bf16.msra.mxu3 %v4919_v33 }
 0x75f   :  { %3509 = vmatpush.bf16.msrb.mxu0 %v4930_v22  ;;  %3494 = vmatpush.bf16.msra.mxu3 %v4918_v58 }
 0x763   :  { %3510 = vmatpush.bf16.msrb.mxu0 %v4929_v27 }
 0x767   :  { %3511 = vmatpush.bf16.msrb.mxu0 %v4928_v30 }
 0x76b   :  { %3512 = vmatpush.bf16.msrb.mxu0 %v4927_v34 }
 0x76f   :  { %3513 = vmatpush.bf16.msrb.mxu0 %v4926_v53 }
 0x798   :  { %v2945_v24 = vpop.f32.mrf.mxu2 }
 0x7a0   :  { %v2947_v37 = vpop.f32.mrf.mxu2 }
 0x7a5   :  { %v2964_v4 = vpop.f32.mrf.mxu3 }
 0x7a7   :  { %v2926_v44 = vpop.f32.mrf.mxu1 }
 0x7a8   :  { %v2927_v12 = vadd.f32 %v4967_v32, %v2926_v44  ;;  %v2950_v47 = vpop.f32.mrf.mxu2 }
 0x7aa   :  { %v2946_v41 = vadd.f32 %v2945_v24, %v2927_v12 }
 0x7ac   :  { %v2965_v46 = vadd.f32 %v2964_v4, %v2946_v41 }
 0x7ad   :  { %v2966_v38 = vpop.f32.mrf.mxu3 }
 0x7ae   :  { %v2974_v51 = vmax.f32 %v2965_v46, 0.0 }
 0x7af   :  { %v2928_v39 = vpop.f32.mrf.mxu1 }
 0x7b0   :  { %v2929_v40 = vadd.f32 %v4967_v32, %v2928_v39  ;;  %v2990_v54 = vrot.slane %v2974_v51, 1  ;;  %v2952_v56 = vpop.f32.mrf.mxu2  ;;  %v2978_v8 = vrot.slane %v2974_v51, 7 }
 0x7b2   :  { %v2948_v42 = vadd.f32 %v2947_v37, %v2929_v40 }
 0x7b4   :  { %v2967_v43 = vadd.f32 %v2966_v38, %v2948_v42 }
 0x7b5   :  { %v2969_v50 = vpop.f32.mrf.mxu3 }
 0x7b6   :  { %v2975_v59 = vmax.f32 %v2967_v43, 0.0 }
 0x7b7   :  { %v2931_v10 = vpop.f32.mrf.mxu1 }
 0x7b8   :  { %v2932_v49 = vadd.f32 %v4967_v32, %v2931_v10  ;;  %v2991_v52 = vrot.slane %v2975_v59, 1  ;;  %v2979_v3 = vrot.slane %v2975_v59, 7 }
 0x7ba   :  { %v2951_v19 = vadd.f32 %v2950_v47, %v2932_v49  ;;  %v2996_v61 = vsel %vm220_vm7, %v2990_v54, %v2991_v52  ;;  %v2984_v21 = vsel %vm207_vm8, %v2978_v8, %v2979_v3  ;;  %v3439_v47 = vpop.f32.mrf.mxu0 }
 0x7bb   :  { %v3003_v14 = vpack.c.bf16 %v2996_v61, %v2996_v61  ;;  %v3004_v57 = vpack.c.bf16 %v2975_v59, %v2984_v21 }
 0x7bc   :  { %v2970_v35 = vadd.f32 %v2969_v50, %v2951_v19 }
 0x7bd   :  { %v2971_v6 = vpop.f32.mrf.mxu3  ;;  %v3020_v26 = vunpack.c.l.b16 %v3003_v14  ;;  %v3021_v4 = vunpack.c.l.b16 %v3004_v57  ;;  %v3022_v44 = vunpack.c.h.b16 %v3004_v57 }
 0x7be   :  { %v2976_v55 = vmax.f32 %v2970_v35, 0.0 }
 0x7bf   :  { %v2933_v60 = vpop.f32.mrf.mxu1 }
 0x7c0   :  { %v2992_v9 = vrot.slane %v2976_v55, 1  ;;  %v2934_v62 = vadd.f32 %v4967_v32, %v2933_v60  ;;  %v2980_v33 = vrot.slane %v2976_v55, 7 }
 0x7c2   :  { %v2995_v63 = vsel %vm220_vm7, %v2991_v52, %v2992_v9  ;;  %v2953_v0 = vadd.f32 %v2952_v56, %v2934_v62  ;;  %v3441_v59 = vpop.f32.mrf.mxu0 }
 0x7c3   :  { %v2999_v45 = vmul.f32 %v5137_v16, %v2995_v63 }
 0x7c4   :  { %v2972_v7 = vadd.f32 %v2971_v6, %v2953_v0  ;;  %v3544_v6 = vld [vmem:[%s5586_s8] sm:$0xff] }
 0x7c5   :  { %v3005_v2 = vpack.c.bf16 %v2999_v45, %v2999_v45 }
 0x7c6   :  { %v2977_v11 = vmax.f32 %v2972_v7, 0.0  ;;  %v4968_v7 = vld [vmem:[%s5587_s9] ss:$0 sm:$0xff] }
 0x7c7   :  { %v3023_v48 = vunpack.c.l.b16 %v3005_v2  ;;  %v3458_v10 = vpop.f32.mrf.mxu1 }
 0x7c8   :  { %v2981_v28 = vrot.slane %v2977_v11, 7  ;;  %v2993_v20 = vrot.slane %v2977_v11, 1 }
 0x7c9   :  { %v3032_v36 = vpack.c.b16 %v3023_v48, %v3020_v26 }
 0x7ca   :  { %v2985_v18 = vsel %vm207_vm8, %v2981_v28, %v2978_v8  ;;  %v2994_v22 = vsel %vm220_vm7, %v2992_v9, %v2993_v20  ;;  %v2997_v16 = vsel %vm220_vm7, %v2993_v20, %v2990_v54  ;;  %v3444_v50 = vpop.f32.mrf.mxu0 }
 0x7cb   :  { %v2986_v23 = vmul.f32 %v5132_v13, %v2985_v18  ;;  %v3007_v24 = vpack.c.bf16 %v2994_v22, %v2994_v22  ;;  %3533 = vmatmul.bf16.vlgmr.msrb.gmra.mxu1 %v3032_v36  ;;  %v3001_v25 = vmul.f32 %v5139_v17, %v2997_v16  ;;  %v2983_v13 = vsel %vm207_vm8, %v2979_v3, %v2980_v33 }
 0x7cc   :  { %v2982_v17 = vsel %vm207_vm8, %v2980_v33, %v2981_v28  ;;  %v2988_v38 = vmul.f32 %v5135_v15, %v2983_v13  ;;  %v4966_v15 = vld [vmem:[%s5582_s4] ss:$0 sm:$0xff] }
 0x7cd   :  { %v3002_v27 = vpack.c.bf16 %v2974_v51, %v2986_v23  ;;  %v3009_v5 = vpack.c.bf16 %v3001_v25, %v3001_v25  ;;  %v3026_v31 = vunpack.c.l.b16 %v3007_v24  ;;  %v3008_v39 = vpack.c.bf16 %v2977_v11, %v2982_v17  ;;  %v3477_v51 = vpop.f32.mrf.mxu2  ;;  %v4969_v11 = vld [vmem:[%s5588_s10] ss:$0 sm:$0xff]  ;;  %v3545_v23 = vld [vmem:[%s5586_s8 + $0x8] sm:$0xff] }
 0x7ce   :  { %v3006_v58 = vpack.c.bf16 %v2976_v55, %v2988_v38  ;;  %v3440_v35 = vadd.f32 %v4966_v15, %v3439_v47  ;;  %v3442_v56 = vadd.f32 %v4966_v15, %v3441_v59  ;;  %v3445_v48 = vadd.f32 %v4966_v15, %v3444_v50 }
 0x7cf   :  { %v3018_v29 = vunpack.c.l.b16 %v3002_v27  ;;  %v3019_v30 = vunpack.c.h.b16 %v3002_v27  ;;  %v3029_v32 = vunpack.c.l.b16 %v3009_v5  ;;  %v3027_v53 = vunpack.c.l.b16 %v3008_v39  ;;  %v3460_v49 = vpop.f32.mrf.mxu1 }
 0x7d0   :  { %v3028_v40 = vunpack.c.h.b16 %v3008_v39  ;;  %v3024_v41 = vunpack.c.l.b16 %v3006_v58  ;;  %v3025_v42 = vunpack.c.h.b16 %v3006_v58  ;;  %v3459_v55 = vadd.f32 %v3458_v10, %v3440_v35 }
 0x7d1   :  { %v3030_v34 = vpack.c.b16 %v3021_v4, %v3018_v29  ;;  %v3031_v37 = vpack.c.b16 %v3022_v44, %v3019_v30  ;;  %v3035_v12 = vpack.c.b16 %v3029_v32, %v3026_v31  ;;  %v3461_v3 = vadd.f32 %v3460_v49, %v3442_v56 }
 0x7d2   :  { %v3033_v43 = vpack.c.b16 %v3027_v53, %v3024_v41  ;;  %v3034_v46 = vpack.c.b16 %v3028_v40, %v3025_v42  ;;  %v3446_v19 = vpop.f32.mrf.mxu0  ;;  %v3478_v61 = vadd.f32 %v3477_v51, %v3459_v55 }
 0x7d3   :  { %3495 = vmatmul.bf16.vlgmr.msra.gmra.mxu3 %v3030_v34  ;;  %3514 = vmatmul.bf16.vlgmr.msrb.gmra.mxu0 %v3031_v37  ;;  %v3447_v44 = vadd.f32 %v4966_v15, %v3446_v19  ;;  %v3546_v37 = vld [vmem:[%s5586_s8 + $0x10] sm:$0xff] }
 0x7d4   :  { %3538 = vmatmul.bf16.vlgmr.msrb.gmra.mxu2 %v3035_v12 }
 0x7d5   :  { %v3479_v52 = vpop.f32.mrf.mxu2 }
 0x7d6   :  { %v3480_v21 = vadd.f32 %v3479_v52, %v3461_v3 }
 0x7d7   :  { %v3463_v1 = vpop.f32.mrf.mxu1 }
 0x7d8   :  { %v3464_v57 = vadd.f32 %v3463_v1, %v3445_v48 }
 0x7dd   :  { %v3482_v9 = vpop.f32.mrf.mxu2 }
 0x7de   :  { %v3483_v27 = vadd.f32 %v3482_v9, %v3464_v57 }
 0x7df   :  { %v3465_v54 = vpop.f32.mrf.mxu1 }
 0x7e0   :  { %v3466_v32 = vadd.f32 %v3465_v54, %v3447_v44 }
 0x7e3   :  { %3500 = vmatmul.bf16.gmra.mxu3 %v3033_v43  ;;  %3519 = vmatmul.bf16.gmra.mxu0 %v3034_v46  ;;  %v3547_v43 = vld [vmem:[%s5586_s8 + $0x18] sm:$0xff] }
 0x7e5   :  { %v3484_v36 = vpop.f32.mrf.mxu2 }
 0x7e6   :  { %v3485_v17 = vadd.f32 %v3484_v36, %v3466_v32 }
 0x848   :  { %v3534_v0 = vpop.f32.mrf.mxu1 }
 0x850   :  { %v3515_v60 = vpop.f32.mrf.mxu0  ;;  %v3536_v16 = vpop.f32.mrf.mxu1 }
 0x856   :  { %v3496_v62 = vpop.f32.mrf.mxu3 }
 0x857   :  { %v3497_v63 = vadd.f32 %v3496_v62, %v3478_v61  ;;  %v3539_v31 = vpop.f32.mrf.mxu2 }
 0x858   :  { %v3517_v8 = vpop.f32.mrf.mxu0 }
 0x859   :  { %v3516_v14 = vadd.f32 %v3515_v60, %v3497_v63 }
 0x85b   :  { %v3535_v45 = vadd.f32 %v3534_v0, %v3516_v14 }
 0x85d   :  { %v3548_v2 = vadd.f32 %v3544_v6, %v3535_v45 }
 0x85e   :  { %v3498_v26 = vpop.f32.mrf.mxu3 }
 0x85f   :  { %v3556_v28 = vmul.f32 %v4968_v7, %v3548_v2  ;;  %v3499_v20 = vadd.f32 %v3498_v26, %v3480_v21  ;;  %v3541_v42 = vpop.f32.mrf.mxu2 }
 0x860   :  { %v3520_v5 = vpop.f32.mrf.mxu0 }
 0x861   :  { %v3564_v18 = vadd.f32 %v4969_v11, %v3556_v28  ;;  %v3518_v22 = vadd.f32 %v3517_v8, %v3499_v20 }
 0x863   :  { %3568 = vst [vmem:[#allocation7] sm:$0xff] %v3564_v18  ;;  %v3537_v24 = vadd.f32 %v3536_v16, %v3518_v22 }
 0x865   :  { %v3549_v25 = vadd.f32 %v3545_v23, %v3537_v24 }
 0x866   :  { %v3501_v4 = vpop.f32.mrf.mxu3 }
 0x867   :  { %v3557_v29 = vmul.f32 %v4968_v7, %v3549_v25  ;;  %v3502_v30 = vadd.f32 %v3501_v4, %v3483_v27 }
 0x868   :  { %v3522_v53 = vpop.f32.mrf.mxu0 }
 0x869   :  { %v3565_v33 = vadd.f32 %v4969_v11, %v3557_v29  ;;  %v3521_v34 = vadd.f32 %v3520_v5, %v3502_v30 }
 0x86b   :  { %3569 = vst [vmem:[#allocation7 + $0x8] sm:$0xff] %v3565_v33  ;;  %v3540_v12 = vadd.f32 %v3539_v31, %v3521_v34 }
 0x86d   :  { %v3550_v13 = vadd.f32 %v3546_v37, %v3540_v12 }
 0x86e   :  { %v3503_v38 = vpop.f32.mrf.mxu3 }
 0x86f   :  { %v3558_v39 = vmul.f32 %v4968_v7, %v3550_v13  ;;  %v3504_v58 = vadd.f32 %v3503_v38, %v3485_v17 }
 0x871   :  { %v3566_v40 = vadd.f32 %v4969_v11, %v3558_v39  ;;  %v3523_v41 = vadd.f32 %v3522_v53, %v3504_v58 }
 0x873   :  { %3570 = vst [vmem:[#allocation7 + $0x10] sm:$0xff] %v3566_v40  ;;  %v3542_v46 = vadd.f32 %v3541_v42, %v3523_v41 }
 0x875   :  { %v3551_v47 = vadd.f32 %v3547_v43, %v3542_v46 }
 0x877   :  { %v3559_v10 = vmul.f32 %v4968_v7, %v3551_v47 }
 0x879   :  { %v3567_v59 = vadd.f32 %v4969_v11, %v3559_v10 }
 0x87b   :  { %3571 = vst [vmem:[#allocation7 + $0x18] sm:$0xff] %v3567_v59 }
 0x87c   :  { %3584 = dma.vmem_to_hbm [thread:$0]  %s3577_s14, 512, %s3579_s16, [#allocation4], %s5054_s17, %s5054_s17, %s5055_s18  }
 0x87d   :  { %5046 = dma.done.wait [#allocation4], 512  }
 0x87e   :  { %5047 = vsyncadd [#allocation4], 4294966784 }
 0x87f   :  { %3589 = vsyncpa [#allocation3], 1 }
 0x880   :  { %3590 = vsyncpa [#allocation6], 1 }
 0x881   :  { %3591 = vsyncpa [#allocation4], 1 }

</bundles_post_ra>
